<compile_context>
chip_gen: v5e
topology: v5e:2x2
jax: 0.10.0
libtpu: 0.0.40
codegen_flags: <defaults>
</compile_context>

<pallas_src>
import functools

import jax
import jax.numpy as jnp
from jax import lax
from jax.experimental import pallas as pl
from jax.experimental.pallas import tpu as pltpu

_TM_MAX = 512  # rows per grid step (multiple of 8)


# -----------------------------------------------------------------------------
# small helpers
# -----------------------------------------------------------------------------
def _round_up(x, m):
    return (x + m - 1) // m * m


def _cdiv(a, b):
    return -(-a // b)


def _pick_tiling(m, tm_max=_TM_MAX, min_steps=2):
    """Return (tm, m_pad).  tm is a multiple of 8 dividing m_pad, preferring
    >= min_steps grid steps (v7x has 2 TensorCores; a grid of 1 also disables
    pipelining) while keeping row padding small."""
    g_min = min_steps if m >= min_steps * 8 else 1
    g = max(g_min, _cdiv(m, tm_max))
    tm = _round_up(_cdiv(m, g), 8)
    return tm, g * tm


def _pad_rows(x, m_pad):
    m = x.shape[0]
    if m_pad == m:
        return x
    return jnp.pad(x, ((0, m_pad - m), (0, 0)))


# -----------------------------------------------------------------------------
# Pallas kernels
# -----------------------------------------------------------------------------
def _conv_mm_kernel(x_ref, w_ref, b_ref, o_ref):
    # out = relu(x @ w + b); conv bias + eval-BN scale/shift folded into w, b.
    y = jnp.dot(x_ref[...], w_ref[...], preferred_element_type=jnp.float32)
    y = jnp.maximum(y + b_ref[...], 0.0)
    o_ref[...] = y.astype(o_ref.dtype)


def _head_kernel(x_ref, w3_ref, b3_ref, wa_ref, ba_ref,
                 w1_ref, b1_ref, w2_ref, b2_ref, o_ref, *,
                 n_spatial, k3p, c3):
    # conv3+BN+ReLU + SpatialAttention + flatten + fc1+ReLU + Dropout(eval) + fc2.
    # x_ref row b holds the n_spatial conv3 patches of image b, each padded to
    # k3p lanes.  fc1 is accumulated per spatial position so the flattened
    # activation never needs to be materialized.
    h = None
    for s in range(n_spatial):
        xs = x_ref[:, s * k3p:(s + 1) * k3p]                       # (tm, k3p) bf16
        f = jnp.dot(xs, w3_ref[...], preferred_element_type=jnp.float32)
        f = jnp.maximum(f + b3_ref[...], 0.0)                      # (tm, 64) f32
        # Degenerate (M,64)@(64,1) attention matmul -> VPU mul + XLU reduce,
        # sigmoid on the EUP; bias is an SMEM scalar.
        logit = jnp.sum(f * wa_ref[...], axis=-1, keepdims=True) + ba_ref[0]
        g = f * jax.nn.sigmoid(logit)
        hs = jnp.dot(g.astype(w1_ref.dtype), w1_ref[s * c3:(s + 1) * c3, :],
                     preferred_element_type=jnp.float32)           # (tm, 512)
        h = hs if h is None else h + hs
    h = jnp.maximum(h + b1_ref[...], 0.0)
    # Dropout(p=0.2): eval-mode identity.
    q = jnp.dot(h.astype(w2_ref.dtype), w2_ref[...],
                preferred_element_type=jnp.float32) + b2_ref[...]
    o_ref[...] = q.astype(o_ref.dtype)


# -----------------------------------------------------------------------------
# Pallas wrappers (M-tiled 1-D grid, "parallel" semantics)
# -----------------------------------------------------------------------------
def fused_conv_layer(patches, w, b):
    """relu(patches @ w + b) with bf16 operands, f32 accumulate, bf16 output."""
    m, k = patches.shape
    n = w.shape[1]
    tm, m_pad = _pick_tiling(m)
    xp = _pad_rows(patches, m_pad)
    ce = pl.CostEstimate(
        flops=2 * m_pad * k * n,
        transcendentals=0,
        bytes_accessed=m_pad * k * 2 + k * n * 2 + n * 4 + m_pad * n * 2)
    out = pl.pallas_call(
        _conv_mm_kernel,
        out_shape=jax.ShapeDtypeStruct((m_pad, n), jnp.bfloat16),
        grid=(m_pad // tm,),
        in_specs=[
            pl.BlockSpec((tm, k), lambda i: (i, 0)),
            pl.BlockSpec((k, n), lambda i: (0, 0)),
            pl.BlockSpec((1, n), lambda i: (0, 0)),
        ],
        out_specs=pl.BlockSpec((tm, n), lambda i: (i, 0)),
        compiler_params=pltpu.CompilerParams(
            dimension_semantics=("parallel",)),
        cost_estimate=ce,
    )(xp, w, b)
    return out[:m]


def fused_head(x, p, num_actions, n_spatial, k3p, c3):
    """conv3 + attention + fc1 + fc2 in one kernel, gridded over batch tiles."""
    m, kk = x.shape                       # kk = n_spatial * k3p
    hdim = p["fc1_w"].shape[1]            # 512
    n_pad = p["fc2_w"].shape[1]           # 128 (lane-padded num_actions)
    tm, m_pad = _pick_tiling(m)
    xp = _pad_rows(x, m_pad)
    flops = 2 * m_pad * (n_spatial * (k3p * c3 + c3 * hdim) + hdim * n_pad)
    bytes_acc = (m_pad * kk * 2 + k3p * c3 * 2 + n_spatial * c3 * hdim * 2
                 + hdim * n_pad * 2 + m_pad * n_pad * 4
                 + (2 * c3 + hdim + n_pad + 1) * 4)
    ce = pl.CostEstimate(flops=flops, transcendentals=m_pad * n_spatial,
                         bytes_accessed=bytes_acc)
    kern = functools.partial(_head_kernel, n_spatial=n_spatial, k3p=k3p, c3=c3)
    out = pl.pallas_call(
        kern,
        out_shape=jax.ShapeDtypeStruct((m_pad, n_pad), jnp.float32),
        grid=(m_pad // tm,),
        in_specs=[
            pl.BlockSpec((tm, kk), lambda i: (i, 0)),
            pl.BlockSpec((k3p, c3), lambda i: (0, 0)),
            pl.BlockSpec((1, c3), lambda i: (0, 0)),
            pl.BlockSpec((1, c3), lambda i: (0, 0)),
            pl.BlockSpec(memory_space=pltpu.MemorySpace.SMEM),  # scalar att bias
            pl.BlockSpec((n_spatial * c3, hdim), lambda i: (0, 0)),
            pl.BlockSpec((1, hdim), lambda i: (0, 0)),
            pl.BlockSpec((hdim, n_pad), lambda i: (0, 0)),
            pl.BlockSpec((1, n_pad), lambda i: (0, 0)),
        ],
        out_specs=pl.BlockSpec((tm, n_pad), lambda i: (i, 0)),
        compiler_params=pltpu.CompilerParams(
            dimension_semantics=("parallel",)),
        cost_estimate=ce,
    )(xp, p["w3"], p["b3"], p["w_att"], p["b_att"],
      p["fc1_w"], p["fc1_b"], p["fc2_w"], p["fc2_b"])
    return out[:m, :num_actions]


# -----------------------------------------------------------------------------
# JAX glue: im2col, parameter construction
# -----------------------------------------------------------------------------
def im2col(x, kh, kw, stride):
    """x: (B,H,W,C) -> (B*oh*ow, kh*kw*C) in PyTorch (kh, kw, cin) ordering."""
    B, H, W, C = x.shape
    oh = (H - kh) // stride + 1
    ow = (W - kw) // stride + 1
    cols = []
    for i in range(kh):
        for j in range(kw):
            cols.append(x[:, i:i + stride * oh:stride, j:j + stride * ow:stride, :])
    patches = jnp.concatenate(cols, axis=-1)  # (B, oh, ow, kh*kw*C)
    return patches.reshape(B * oh * ow, kh * kw * C), oh, ow


def _conv_w_to_mat(w):
    """PyTorch conv weight (cout,cin,kh,kw) -> im2col matrix (kh*kw*cin, cout)."""
    cout, cin, kh, kw = w.shape
    return jnp.transpose(w, (2, 3, 1, 0)).reshape(kh * kw * cin, cout)


def _fold_bn(w_mat, conv_b, gamma, beta, mean, var, eps=1e-5):
    """Fold conv bias + eval BatchNorm into the im2col weights and a bias row."""
    scale = gamma / jnp.sqrt(var + eps)
    w_f = w_mat * scale[None, :]
    b_f = (conv_b - mean) * scale + beta
    return w_f, b_f[None, :]


def init_raw_params(key, in_channels, num_actions, conv_out_size):
    """Raw PyTorch-layout parameters (each tensor gets its own PRNG key)."""
    ks = jax.random.split(key, 24)

    def norm(k, shape, std=0.05):
        return std * jax.random.normal(k, shape, dtype=jnp.float32)

    raw = {}
    raw["w1"], raw["b1"] = norm(ks[0], (32, in_channels, 8, 8)), norm(ks[1], (32,))
    raw["g1"] = 1.0 + 0.1 * jax.random.normal(ks[2], (32,), dtype=jnp.float32)
    raw["be1"] = norm(ks[3], (32,))
    raw["m1"] = norm(ks[4], (32,))
    raw["v1"] = 1.0 + 0.1 * jax.random.uniform(ks[5], (32,), dtype=jnp.float32)
    raw["w2"], raw["b2"] = norm(ks[6], (64, 32, 4, 4)), norm(ks[7], (64,))
    raw["g2"] = 1.0 + 0.1 * jax.random.normal(ks[8], (64,), dtype=jnp.float32)
    raw["be2"] = norm(ks[9], (64,))
    raw["m2"] = norm(ks[10], (64,))
    raw["v2"] = 1.0 + 0.1 * jax.random.uniform(ks[11], (64,), dtype=jnp.float32)
    raw["w3"], raw["b3"] = norm(ks[12], (64, 64, 3, 3)), norm(ks[13], (64,))
    raw["g3"] = 1.0 + 0.1 * jax.random.normal(ks[14], (64,), dtype=jnp.float32)
    raw["be3"] = norm(ks[15], (64,))
    raw["m3"] = norm(ks[16], (64,))
    raw["v3"] = 1.0 + 0.1 * jax.random.uniform(ks[17], (64,), dtype=jnp.float32)
    raw["w_att"] = norm(ks[18], (1, 64, 1, 1))
    raw["b_att"] = norm(ks[19], (1,))
    raw["fc1_w"] = norm(ks[20], (512, conv_out_size))
    raw["fc1_b"] = norm(ks[21], (512,))
    raw["fc2_w"] = norm(ks[22], (num_actions, 512))
    raw["fc2_b"] = norm(ks[23], (num_actions,))
    return raw


def build_pallas_params(raw, num_actions, oh, ow, eps=1e-5):
    """Fold 1/255 + BN into conv weights (f32), CHW flatten into fc1, pad fc2
    lanes and conv3's contraction dim, then cast MXU operands to bf16."""
    p = {}
    w1, b1 = _fold_bn(_conv_w_to_mat(raw["w1"]) / 255.0, raw["b1"],
                      raw["g1"], raw["be1"], raw["m1"], raw["v1"], eps)
    w2, b2 = _fold_bn(_conv_w_to_mat(raw["w2"]), raw["b2"],
                      raw["g2"], raw["be2"], raw["m2"], raw["v2"], eps)
    w3, b3 = _fold_bn(_conv_w_to_mat(raw["w3"]), raw["b3"],
                      raw["g3"], raw["be3"], raw["m3"], raw["v3"], eps)
    p["w1"], p["b1"] = w1.astype(jnp.bfloat16), b1
    p["w2"], p["b2"] = w2.astype(jnp.bfloat16), b2

    k3 = w3.shape[0]                       # 576
    k3p = _round_up(k3, 128)               # 640: lane-dense loads, clean K passes
    p["w3"] = jnp.pad(w3, ((0, k3p - k3), (0, 0))).astype(jnp.bfloat16)
    p["b3"] = b3

    p["w_att"] = raw["w_att"].reshape(1, 64)          # f32 row for VPU reduce
    p["b_att"] = raw["b_att"].reshape(1)              # SMEM scalar

    # fc1: permute weight rows so the per-spatial NHWC accumulation matches
    # PyTorch's (C,H,W) flatten order; row index = s*64 + c.
    fc1_w = raw["fc1_w"].reshape(512, 64, oh, ow)
    p["fc1_w"] = jnp.transpose(fc1_w, (2, 3, 1, 0)).reshape(
        oh * ow * 64, 512).astype(jnp.bfloat16)
    p["fc1_b"] = raw["fc1_b"][None, :]

    # fc2: zero-pad output features to a full 128-lane slab (lane-dense store).
    n_pad = _round_up(max(num_actions, 128), 128)
    p["fc2_w"] = jnp.zeros((512, n_pad), jnp.float32).at[:, :num_actions].set(
        raw["fc2_w"].T).astype(jnp.bfloat16)
    p["fc2_b"] = jnp.zeros((1, n_pad), jnp.float32).at[:, :num_actions].set(
        raw["fc2_b"][None, :])
    return p


# -----------------------------------------------------------------------------
# Forward passes
# -----------------------------------------------------------------------------
def dqn_forward_pallas(x_nchw, p, num_actions):
    B = x_nchw.shape[0]
    # 1/255 scaling is folded into w1; activations stay NHWC bf16 end-to-end.
    x = jnp.transpose(x_nchw.astype(jnp.float32), (0, 2, 3, 1)).astype(jnp.bfloat16)

    # conv1 + BN + ReLU
    pch, oh, ow = im2col(x, 8, 8, 4)
    x = fused_conv_layer(pch, p["w1"], p["b1"]).reshape(B, oh, ow, 32)
    # conv2 + BN + ReLU
    pch, oh, ow = im2col(x, 4, 4, 2)
    x = fused_conv_layer(pch, p["w2"], p["b2"]).reshape(B, oh, ow, 64)

    # conv3 patches -> one lane-dense (B, S*k3p) slab per image (K padded to 640).
    pch, oh3, ow3 = im2col(x, 3, 3, 1)
    k3 = pch.shape[1]
    c3 = p["w3"].shape[1]
    k3p = p["w3"].shape[0]
    s3 = oh3 * ow3
    pch = jnp.pad(pch.reshape(B, s3, k3), ((0, 0), (0, 0), (0, k3p - k3)))
    pch = pch.reshape(B, s3 * k3p)

    # conv3 + BN + ReLU + attention + flatten + fc1 + ReLU + Dropout(eval) + fc2
    return fused_head(pch, p, num_actions, s3, k3p, c3)


def reference_forward(x_nchw, raw, eps=1e-5):
    """Pure-JAX reference with PyTorch semantics (NCHW convs, BN, CHW flatten)."""
    hi = lax.Precision.HIGHEST
    x = x_nchw.astype(jnp.float32) / 255.0

    def conv_bn_relu(x, w, b, g, be, m, v, stride):
        y = lax.conv_general_dilated(
            x, w, window_strides=(stride, stride), padding="VALID",
            dimension_numbers=("NCHW", "OIHW", "NCHW"), precision=hi)
        y = y + b[None, :, None, None]
        y = (y - m[None, :, None, None]) / jnp.sqrt(v[None, :, None, None] + eps)
        y = y * g[None, :, None, None] + be[None, :, None, None]
        return jnp.maximum(y, 0.0)

    x = conv_bn_relu(x, raw["w1"], raw["b1"], raw["g1"], raw["be1"],
                     raw["m1"], raw["v1"], 4)
    x = conv_bn_relu(x, raw["w2"], raw["b2"], raw["g2"], raw["be2"],
                     raw["m2"], raw["v2"], 2)
    x = conv_bn_relu(x, raw["w3"], raw["b3"], raw["g3"], raw["be3"],
                     raw["m3"], raw["v3"], 1)
    att = jax.nn.sigmoid(
        lax.conv_general_dilated(
            x, raw["w_att"], window_strides=(1, 1), padding="VALID",
            dimension_numbers=("NCHW", "OIHW", "NCHW"), precision=hi)
        + raw["b_att"][None, :, None, None])
    x = x * att
    flat = x.reshape(x.shape[0], -1)
    h = jnp.maximum(jnp.matmul(flat, raw["fc1_w"].T, precision=hi)
                    + raw["fc1_b"], 0.0)
    return jnp.matmul(h, raw["fc2_w"].T, precision=hi) + raw["fc2_b"]


# -----------------------------------------------------------------------------
if __name__ == "__main__":
    # DQN-ish shapes: input_shape=(4,44,44), batch=2, num_actions=6.
    # Conv chain: 44 -> 10 -> 4 -> 2, so conv_output_size = 64*2*2 = 256.
    B, C, H, W = 2, 4, 44, 44
    num_actions = 6
    oh1 = (H - 8) // 4 + 1
    oh2 = (oh1 - 4) // 2 + 1
    oh3 = oh2 - 3 + 1
    conv_out_size = 64 * oh3 * oh3

    key = jax.random.PRNGKey(0)
    k_x, k_p = jax.random.split(key)
    x = jax.random.uniform(k_x, (B, C, H, W), jnp.float32, 0.0, 255.0)

    raw = init_raw_params(k_p, C, num_actions, conv_out_size)
    params = build_pallas_params(raw, num_actions, oh3, oh3)

    fwd = jax.jit(dqn_forward_pallas, static_argnums=(2,))
    q = jax.block_until_ready(fwd(x, params, num_actions))

    q_ref = jax.block_until_ready(reference_forward(x, raw))

    assert q.shape == (B, num_actions)
    # bf16 MXU operands (f32 accumulation) vs f32 HIGHEST reference.
    assert jnp.allclose(q, q_ref, rtol=2e-2, atol=2e-2), (
        "Pallas output diverged from reference: max|diff|="
        f"{float(jnp.max(jnp.abs(q - q_ref)))}")

    print("KERNEL_OK")
</pallas_src>

<mosaic_0001>
module attributes {stable_mosaic.version = 11 : i64} {
  func.func @_conv_mm_kernel(%arg0: i32, %arg1: memref<104x256xbf16, #tpu.memory_space<vmem>>, %arg2: memref<256x32xbf16, #tpu.memory_space<vmem>>, %arg3: memref<1x32xf32, #tpu.memory_space<vmem>>, %arg4: memref<104x32xbf16, #tpu.memory_space<vmem>>) attributes {dimension_semantics = [#tpu.dimension_semantics<parallel>], iteration_bounds = array<i64: 2>, scalar_prefetch = 0 : i64, scratch_operands = 0 : i64, tpu.core_type = #tpu.core_type<tc>, window_params = [{transform_indices = @transform_0, window_bounds = array<i64: 104, 256>}, {pipeline_mode = #tpu.pipeline_mode<synchronous>, transform_indices = @transform_1, window_bounds = array<i64: 256, 32>}, {pipeline_mode = #tpu.pipeline_mode<synchronous>, transform_indices = @transform_2, window_bounds = array<i64: 1, 32>}, {transform_indices = @transform_3, window_bounds = array<i64: 104, 32>}]} {
    %c0 = arith.constant 0 : index
    %c0_0 = arith.constant 0 : index
    %0 = vector.load %arg1[%c0, %c0_0] : memref<104x256xbf16, #tpu.memory_space<vmem>>, vector<104x256xbf16>
    %c0_1 = arith.constant 0 : index
    %c0_2 = arith.constant 0 : index
    %1 = vector.load %arg2[%c0_1, %c0_2] : memref<256x32xbf16, #tpu.memory_space<vmem>>, vector<256x32xbf16>
    %cst = arith.constant dense<0.000000e+00> : vector<104x32xf32>
    %2 = tpu.matmul %0, %1, %cst {dimension_numbers = #tpu.dot_dimension_numbers<[1], [0], [0], [1], [0, 0, 1, 1], [], []>} : vector<104x256xbf16>, vector<256x32xbf16>, vector<104x32xf32> -> vector<104x32xf32>
    %c0_3 = arith.constant 0 : index
    %c0_4 = arith.constant 0 : index
    %3 = vector.load %arg3[%c0_3, %c0_4] : memref<1x32xf32, #tpu.memory_space<vmem>>, vector<1x32xf32>
    %4 = vector.broadcast %3 : vector<1x32xf32> to vector<104x32xf32>
    %5 = arith.addf %2, %4 : vector<104x32xf32>
    %cst_5 = arith.constant 0.000000e+00 : f32
    %6 = vector.broadcast %cst_5 : f32 to vector<104x32xf32>
    %7 = arith.maximumf %5, %6 : vector<104x32xf32>
    %8 = arith.truncf %7 : vector<104x32xf32> to vector<104x32xbf16>
    %c0_6 = arith.constant 0 : index
    %c0_7 = arith.constant 0 : index
    %9 = vector.load %arg4[%c0_6, %c0_7] : memref<104x32xbf16, #tpu.memory_space<vmem>>, vector<104x32xbf16>
    tpu.vector_store %arg4[%c0_6, %c0_7], %8 {strides = array<i32>} : memref<104x32xbf16, #tpu.memory_space<vmem>>, vector<104x32xbf16>,
    return
  }
  func.func @transform_0(%arg0: i32) -> (i32, i32) {
    %c0_i32 = arith.constant 0 : i32
    %c0_i32_0 = arith.constant 0 : i32
    return %arg0, %c0_i32 : i32, i32
  }
  func.func @transform_1(%arg0: i32) -> (i32, i32) {
    %c0_i32 = arith.constant 0 : i32
    %c0_i32_0 = arith.constant 0 : i32
    %c0_i32_1 = arith.constant 0 : i32
    return %c0_i32, %c0_i32_0 : i32, i32
  }
  func.func @transform_2(%arg0: i32) -> (i32, i32) {
    %c0_i32 = arith.constant 0 : i32
    %c0_i32_0 = arith.constant 0 : i32
    %c0_i32_1 = arith.constant 0 : i32
    return %c0_i32, %c0_i32_0 : i32, i32
  }
  func.func @transform_3(%arg0: i32) -> (i32, i32) {
    %c0_i32 = arith.constant 0 : i32
    %c0_i32_0 = arith.constant 0 : i32
    return %arg0, %c0_i32 : i32, i32
  }
}

module attributes {stable_mosaic.version = 11 : i64} {
  func.func @_conv_mm_kernel(%arg0: i32, %arg1: memref<16x512xbf16, #tpu.memory_space<vmem>>, %arg2: memref<512x64xbf16, #tpu.memory_space<vmem>>, %arg3: memref<1x64xf32, #tpu.memory_space<vmem>>, %arg4: memref<16x64xbf16, #tpu.memory_space<vmem>>) attributes {dimension_semantics = [#tpu.dimension_semantics<parallel>], iteration_bounds = array<i64: 2>, scalar_prefetch = 0 : i64, scratch_operands = 0 : i64, tpu.core_type = #tpu.core_type<tc>, window_params = [{transform_indices = @transform_0, window_bounds = array<i64: 16, 512>}, {pipeline_mode = #tpu.pipeline_mode<synchronous>, transform_indices = @transform_1, window_bounds = array<i64: 512, 64>}, {pipeline_mode = #tpu.pipeline_mode<synchronous>, transform_indices = @transform_2, window_bounds = array<i64: 1, 64>}, {transform_indices = @transform_3, window_bounds = array<i64: 16, 64>}]} {
    %c0 = arith.constant 0 : index
    %c0_0 = arith.constant 0 : index
    %0 = vector.load %arg1[%c0, %c0_0] : memref<16x512xbf16, #tpu.memory_space<vmem>>, vector<16x512xbf16>
    %c0_1 = arith.constant 0 : index
    %c0_2 = arith.constant 0 : index
    %1 = vector.load %arg2[%c0_1, %c0_2] : memref<512x64xbf16, #tpu.memory_space<vmem>>, vector<512x64xbf16>
    %cst = arith.constant dense<0.000000e+00> : vector<16x64xf32>
    %2 = tpu.matmul %0, %1, %cst {dimension_numbers = #tpu.dot_dimension_numbers<[1], [0], [0], [1], [0, 0, 1, 1], [], []>} : vector<16x512xbf16>, vector<512x64xbf16>, vector<16x64xf32> -> vector<16x64xf32>
    %c0_3 = arith.constant 0 : index
    %c0_4 = arith.constant 0 : index
    %3 = vector.load %arg3[%c0_3, %c0_4] : memref<1x64xf32, #tpu.memory_space<vmem>>, vector<1x64xf32>
    %4 = vector.broadcast %3 : vector<1x64xf32> to vector<16x64xf32>
    %5 = arith.addf %2, %4 : vector<16x64xf32>
    %cst_5 = arith.constant 0.000000e+00 : f32
    %6 = vector.broadcast %cst_5 : f32 to vector<16x64xf32>
    %7 = arith.maximumf %5, %6 : vector<16x64xf32>
    %8 = arith.truncf %7 : vector<16x64xf32> to vector<16x64xbf16>
    %c0_6 = arith.constant 0 : index
    %c0_7 = arith.constant 0 : index
    %9 = vector.load %arg4[%c0_6, %c0_7] : memref<16x64xbf16, #tpu.memory_space<vmem>>, vector<16x64xbf16>
    tpu.vector_store %arg4[%c0_6, %c0_7], %8 {strides = array<i32>} : memref<16x64xbf16, #tpu.memory_space<vmem>>, vector<16x64xbf16>,
    return
  }
  func.func @transform_0(%arg0: i32) -> (i32, i32) {
    %c0_i32 = arith.constant 0 : i32
    %c0_i32_0 = arith.constant 0 : i32
    return %arg0, %c0_i32 : i32, i32
  }
  func.func @transform_1(%arg0: i32) -> (i32, i32) {
    %c0_i32 = arith.constant 0 : i32
    %c0_i32_0 = arith.constant 0 : i32
    %c0_i32_1 = arith.constant 0 : i32
    return %c0_i32, %c0_i32_0 : i32, i32
  }
  func.func @transform_2(%arg0: i32) -> (i32, i32) {
    %c0_i32 = arith.constant 0 : i32
    %c0_i32_0 = arith.constant 0 : i32
    %c0_i32_1 = arith.constant 0 : i32
    return %c0_i32, %c0_i32_0 : i32, i32
  }
  func.func @transform_3(%arg0: i32) -> (i32, i32) {
    %c0_i32 = arith.constant 0 : i32
    %c0_i32_0 = arith.constant 0 : i32
    return %arg0, %c0_i32 : i32, i32
  }
}

module attributes {stable_mosaic.version = 11 : i64} {
  func.func @_head_kernel(%arg0: i32, %arg1: memref<8x2560xbf16, #tpu.memory_space<vmem>>, %arg2: memref<640x64xbf16, #tpu.memory_space<vmem>>, %arg3: memref<1x64xf32, #tpu.memory_space<vmem>>, %arg4: memref<1x64xf32, #tpu.memory_space<vmem>>, %arg5: memref<1xf32, #tpu.memory_space<smem>>, %arg6: memref<256x512xbf16, #tpu.memory_space<vmem>>, %arg7: memref<1x512xf32, #tpu.memory_space<vmem>>, %arg8: memref<512x128xbf16, #tpu.memory_space<vmem>>, %arg9: memref<1x128xf32, #tpu.memory_space<vmem>>, %arg10: memref<8x128xf32, #tpu.memory_space<vmem>>) attributes {dimension_semantics = [#tpu.dimension_semantics<parallel>], iteration_bounds = array<i64: 1>, scalar_prefetch = 0 : i64, scratch_operands = 0 : i64, tpu.core_type = #tpu.core_type<tc>, window_params = [{transform_indices = @transform_0, window_bounds = array<i64: 8, 2560>}, {pipeline_mode = #tpu.pipeline_mode<synchronous>, transform_indices = @transform_1, window_bounds = array<i64: 640, 64>}, {pipeline_mode = #tpu.pipeline_mode<synchronous>, transform_indices = @transform_2, window_bounds = array<i64: 1, 64>}, {pipeline_mode = #tpu.pipeline_mode<synchronous>, transform_indices = @transform_3, window_bounds = array<i64: 1, 64>}, {transform_indices = @transform_4, window_bounds = array<i64: 1>}, {pipeline_mode = #tpu.pipeline_mode<synchronous>, transform_indices = @transform_5, window_bounds = array<i64: 256, 512>}, {pipeline_mode = #tpu.pipeline_mode<synchronous>, transform_indices = @transform_6, window_bounds = array<i64: 1, 512>}, {pipeline_mode = #tpu.pipeline_mode<synchronous>, transform_indices = @transform_7, window_bounds = array<i64: 512, 128>}, {pipeline_mode = #tpu.pipeline_mode<synchronous>, transform_indices = @transform_8, window_bounds = array<i64: 1, 128>}, {transform_indices = @transform_9, window_bounds = array<i64: 8, 128>}]} {
    %c0 = arith.constant 0 : index
    %c0_0 = arith.constant 0 : index
    %0 = vector.load %arg1[%c0, %c0_0] : memref<8x2560xbf16, #tpu.memory_space<vmem>>, vector<8x640xbf16>
    %c0_1 = arith.constant 0 : index
    %c0_2 = arith.constant 0 : index
    %1 = vector.load %arg2[%c0_1, %c0_2] : memref<640x64xbf16, #tpu.memory_space<vmem>>, vector<640x64xbf16>
    %cst = arith.constant dense<0.000000e+00> : vector<8x64xf32>
    %2 = tpu.matmul %0, %1, %cst {dimension_numbers = #tpu.dot_dimension_numbers<[1], [0], [0], [1], [0, 0, 1, 1], [], []>} : vector<8x640xbf16>, vector<640x64xbf16>, vector<8x64xf32> -> vector<8x64xf32>
    %c0_3 = arith.constant 0 : index
    %c0_4 = arith.constant 0 : index
    %3 = vector.load %arg3[%c0_3, %c0_4] : memref<1x64xf32, #tpu.memory_space<vmem>>, vector<1x64xf32>
    %4 = vector.broadcast %3 : vector<1x64xf32> to vector<8x64xf32>
    %5 = arith.addf %2, %4 : vector<8x64xf32>
    %cst_5 = arith.constant 0.000000e+00 : f32
    %6 = vector.broadcast %cst_5 : f32 to vector<8x64xf32>
    %7 = arith.maximumf %5, %6 : vector<8x64xf32>
    %c0_6 = arith.constant 0 : index
    %c0_7 = arith.constant 0 : index
    %8 = vector.load %arg4[%c0_6, %c0_7] : memref<1x64xf32, #tpu.memory_space<vmem>>, vector<1x64xf32>
    %9 = vector.broadcast %8 : vector<1x64xf32> to vector<8x64xf32>
    %10 = arith.mulf %7, %9 : vector<8x64xf32>
    %cst_8 = arith.constant dense<0.000000e+00> : vector<8xf32>
    %11 = vector.multi_reduction <add>, %10, %cst_8 [1] : vector<8x64xf32> to vector<8xf32>
    %12 = vector.shape_cast %11 : vector<8xf32> to vector<8x1xf32>
    %c0_9 = arith.constant 0 : index
    %13 = memref.load %arg5[%c0_9] : memref<1xf32, #tpu.memory_space<smem>>
    %14 = vector.broadcast %13 : f32 to vector<8x1xf32>
    %15 = arith.addf %12, %14 : vector<8x1xf32>
    %16 = arith.negf %15 : vector<8x1xf32>
    %17 = math.exp %16 : vector<8x1xf32>
    %cst_10 = arith.constant 1.000000e+00 : f32
    %18 = vector.broadcast %cst_10 : f32 to vector<8x1xf32>
    %19 = arith.addf %18, %17 : vector<8x1xf32>
    %20 = arith.divf %18, %19 : vector<8x1xf32>
    %21 = vector.broadcast %20 : vector<8x1xf32> to vector<8x64xf32>
    %22 = arith.mulf %7, %21 : vector<8x64xf32>
    %23 = arith.truncf %22 : vector<8x64xf32> to vector<8x64xbf16>
    %c0_11 = arith.constant 0 : index
    %c0_12 = arith.constant 0 : index
    %24 = vector.load %arg6[%c0_11, %c0_12] : memref<256x512xbf16, #tpu.memory_space<vmem>>, vector<64x512xbf16>
    %cst_13 = arith.constant dense<0.000000e+00> : vector<8x512xf32>
    %25 = tpu.matmul %23, %24, %cst_13 {dimension_numbers = #tpu.dot_dimension_numbers<[1], [0], [0], [1], [0, 0, 1, 1], [], []>} : vector<8x64xbf16>, vector<64x512xbf16>, vector<8x512xf32> -> vector<8x512xf32>
    %c0_14 = arith.constant 0 : index
    %c640 = arith.constant 640 : index
    %26 = vector.load %arg1[%c0_14, %c640] : memref<8x2560xbf16, #tpu.memory_space<vmem>>, vector<8x640xbf16>
    %c0_15 = arith.constant 0 : index
    %c0_16 = arith.constant 0 : index
    %27 = vector.load %arg2[%c0_15, %c0_16] : memref<640x64xbf16, #tpu.memory_space<vmem>>, vector<640x64xbf16>
    %cst_17 = arith.constant dense<0.000000e+00> : vector<8x64xf32>
    %28 = tpu.matmul %26, %27, %cst_17 {dimension_numbers = #tpu.dot_dimension_numbers<[1], [0], [0], [1], [0, 0, 1, 1], [], []>} : vector<8x640xbf16>, vector<640x64xbf16>, vector<8x64xf32> -> vector<8x64xf32>
    %c0_18 = arith.constant 0 : index
    %c0_19 = arith.constant 0 : index
    %29 = vector.load %arg3[%c0_18, %c0_19] : memref<1x64xf32, #tpu.memory_space<vmem>>, vector<1x64xf32>
    %30 = vector.broadcast %29 : vector<1x64xf32> to vector<8x64xf32>
    %31 = arith.addf %28, %30 : vector<8x64xf32>
    %cst_20 = arith.constant 0.000000e+00 : f32
    %32 = vector.broadcast %cst_20 : f32 to vector<8x64xf32>
    %33 = arith.maximumf %31, %32 : vector<8x64xf32>
    %c0_21 = arith.constant 0 : index
    %c0_22 = arith.constant 0 : index
    %34 = vector.load %arg4[%c0_21, %c0_22] : memref<1x64xf32, #tpu.memory_space<vmem>>, vector<1x64xf32>
    %35 = vector.broadcast %34 : vector<1x64xf32> to vector<8x64xf32>
    %36 = arith.mulf %33, %35 : vector<8x64xf32>
    %cst_23 = arith.constant dense<0.000000e+00> : vector<8xf32>
    %37 = vector.multi_reduction <add>, %36, %cst_23 [1] : vector<8x64xf32> to vector<8xf32>
    %38 = vector.shape_cast %37 : vector<8xf32> to vector<8x1xf32>
    %c0_24 = arith.constant 0 : index
    %39 = memref.load %arg5[%c0_24] : memref<1xf32, #tpu.memory_space<smem>>
    %40 = vector.broadcast %39 : f32 to vector<8x1xf32>
    %41 = arith.addf %38, %40 : vector<8x1xf32>
    %42 = arith.negf %41 : vector<8x1xf32>
    %43 = math.exp %42 : vector<8x1xf32>
    %cst_25 = arith.constant 1.000000e+00 : f32
    %44 = vector.broadcast %cst_25 : f32 to vector<8x1xf32>
    %45 = arith.addf %44, %43 : vector<8x1xf32>
    %46 = arith.divf %44, %45 : vector<8x1xf32>
    %47 = vector.broadcast %46 : vector<8x1xf32> to vector<8x64xf32>
    %48 = arith.mulf %33, %47 : vector<8x64xf32>
    %49 = arith.truncf %48 : vector<8x64xf32> to vector<8x64xbf16>
    %c64 = arith.constant 64 : index
    %c0_26 = arith.constant 0 : index
    %50 = vector.load %arg6[%c64, %c0_26] : memref<256x512xbf16, #tpu.memory_space<vmem>>, vector<64x512xbf16>
    %cst_27 = arith.constant dense<0.000000e+00> : vector<8x512xf32>
    %51 = tpu.matmul %49, %50, %cst_27 {dimension_numbers = #tpu.dot_dimension_numbers<[1], [0], [0], [1], [0, 0, 1, 1], [], []>} : vector<8x64xbf16>, vector<64x512xbf16>, vector<8x512xf32> -> vector<8x512xf32>
    %52 = arith.addf %25, %51 : vector<8x512xf32>
    %c0_28 = arith.constant 0 : index
    %c1280 = arith.constant 1280 : index
    %53 = vector.load %arg1[%c0_28, %c1280] : memref<8x2560xbf16, #tpu.memory_space<vmem>>, vector<8x640xbf16>
    %c0_29 = arith.constant 0 : index
    %c0_30 = arith.constant 0 : index
    %54 = vector.load %arg2[%c0_29, %c0_30] : memref<640x64xbf16, #tpu.memory_space<vmem>>, vector<640x64xbf16>
    %cst_31 = arith.constant dense<0.000000e+00> : vector<8x64xf32>
    %55 = tpu.matmul %53, %54, %cst_31 {dimension_numbers = #tpu.dot_dimension_numbers<[1], [0], [0], [1], [0, 0, 1, 1], [], []>} : vector<8x640xbf16>, vector<640x64xbf16>, vector<8x64xf32> -> vector<8x64xf32>
    %c0_32 = arith.constant 0 : index
    %c0_33 = arith.constant 0 : index
    %56 = vector.load %arg3[%c0_32, %c0_33] : memref<1x64xf32, #tpu.memory_space<vmem>>, vector<1x64xf32>
    %57 = vector.broadcast %56 : vector<1x64xf32> to vector<8x64xf32>
    %58 = arith.addf %55, %57 : vector<8x64xf32>
    %cst_34 = arith.constant 0.000000e+00 : f32
    %59 = vector.broadcast %cst_34 : f32 to vector<8x64xf32>
    %60 = arith.maximumf %58, %59 : vector<8x64xf32>
    %c0_35 = arith.constant 0 : index
    %c0_36 = arith.constant 0 : index
    %61 = vector.load %arg4[%c0_35, %c0_36] : memref<1x64xf32, #tpu.memory_space<vmem>>, vector<1x64xf32>
    %62 = vector.broadcast %61 : vector<1x64xf32> to vector<8x64xf32>
    %63 = arith.mulf %60, %62 : vector<8x64xf32>
    %cst_37 = arith.constant dense<0.000000e+00> : vector<8xf32>
    %64 = vector.multi_reduction <add>, %63, %cst_37 [1] : vector<8x64xf32> to vector<8xf32>
    %65 = vector.shape_cast %64 : vector<8xf32> to vector<8x1xf32>
    %c0_38 = arith.constant 0 : index
    %66 = memref.load %arg5[%c0_38] : memref<1xf32, #tpu.memory_space<smem>>
    %67 = vector.broadcast %66 : f32 to vector<8x1xf32>
    %68 = arith.addf %65, %67 : vector<8x1xf32>
    %69 = arith.negf %68 : vector<8x1xf32>
    %70 = math.exp %69 : vector<8x1xf32>
    %cst_39 = arith.constant 1.000000e+00 : f32
    %71 = vector.broadcast %cst_39 : f32 to vector<8x1xf32>
    %72 = arith.addf %71, %70 : vector<8x1xf32>
    %73 = arith.divf %71, %72 : vector<8x1xf32>
    %74 = vector.broadcast %73 : vector<8x1xf32> to vector<8x64xf32>
    %75 = arith.mulf %60, %74 : vector<8x64xf32>
    %76 = arith.truncf %75 : vector<8x64xf32> to vector<8x64xbf16>
    %c128 = arith.constant 128 : index
    %c0_40 = arith.constant 0 : index
    %77 = vector.load %arg6[%c128, %c0_40] : memref<256x512xbf16, #tpu.memory_space<vmem>>, vector<64x512xbf16>
    %cst_41 = arith.constant dense<0.000000e+00> : vector<8x512xf32>
    %78 = tpu.matmul %76, %77, %cst_41 {dimension_numbers = #tpu.dot_dimension_numbers<[1], [0], [0], [1], [0, 0, 1, 1], [], []>} : vector<8x64xbf16>, vector<64x512xbf16>, vector<8x512xf32> -> vector<8x512xf32>
    %79 = arith.addf %52, %78 : vector<8x512xf32>
    %c0_42 = arith.constant 0 : index
    %c1920 = arith.constant 1920 : index
    %80 = vector.load %arg1[%c0_42, %c1920] : memref<8x2560xbf16, #tpu.memory_space<vmem>>, vector<8x640xbf16>
    %c0_43 = arith.constant 0 : index
    %c0_44 = arith.constant 0 : index
    %81 = vector.load %arg2[%c0_43, %c0_44] : memref<640x64xbf16, #tpu.memory_space<vmem>>, vector<640x64xbf16>
    %cst_45 = arith.constant dense<0.000000e+00> : vector<8x64xf32>
    %82 = tpu.matmul %80, %81, %cst_45 {dimension_numbers = #tpu.dot_dimension_numbers<[1], [0], [0], [1], [0, 0, 1, 1], [], []>} : vector<8x640xbf16>, vector<640x64xbf16>, vector<8x64xf32> -> vector<8x64xf32>
    %c0_46 = arith.constant 0 : index
    %c0_47 = arith.constant 0 : index
    %83 = vector.load %arg3[%c0_46, %c0_47] : memref<1x64xf32, #tpu.memory_space<vmem>>, vector<1x64xf32>
    %84 = vector.broadcast %83 : vector<1x64xf32> to vector<8x64xf32>
    %85 = arith.addf %82, %84 : vector<8x64xf32>
    %cst_48 = arith.constant 0.000000e+00 : f32
    %86 = vector.broadcast %cst_48 : f32 to vector<8x64xf32>
    %87 = arith.maximumf %85, %86 : vector<8x64xf32>
    %c0_49 = arith.constant 0 : index
    %c0_50 = arith.constant 0 : index
    %88 = vector.load %arg4[%c0_49, %c0_50] : memref<1x64xf32, #tpu.memory_space<vmem>>, vector<1x64xf32>
    %89 = vector.broadcast %88 : vector<1x64xf32> to vector<8x64xf32>
    %90 = arith.mulf %87, %89 : vector<8x64xf32>
    %cst_51 = arith.constant dense<0.000000e+00> : vector<8xf32>
    %91 = vector.multi_reduction <add>, %90, %cst_51 [1] : vector<8x64xf32> to vector<8xf32>
    %92 = vector.shape_cast %91 : vector<8xf32> to vector<8x1xf32>
    %c0_52 = arith.constant 0 : index
    %93 = memref.load %arg5[%c0_52] : memref<1xf32, #tpu.memory_space<smem>>
    %94 = vector.broadcast %93 : f32 to vector<8x1xf32>
    %95 = arith.addf %92, %94 : vector<8x1xf32>
    %96 = arith.negf %95 : vector<8x1xf32>
    %97 = math.exp %96 : vector<8x1xf32>
    %cst_53 = arith.constant 1.000000e+00 : f32
    %98 = vector.broadcast %cst_53 : f32 to vector<8x1xf32>
    %99 = arith.addf %98, %97 : vector<8x1xf32>
    %100 = arith.divf %98, %99 : vector<8x1xf32>
    %101 = vector.broadcast %100 : vector<8x1xf32> to vector<8x64xf32>
    %102 = arith.mulf %87, %101 : vector<8x64xf32>
    %103 = arith.truncf %102 : vector<8x64xf32> to vector<8x64xbf16>
    %c192 = arith.constant 192 : index
    %c0_54 = arith.constant 0 : index
    %104 = vector.load %arg6[%c192, %c0_54] : memref<256x512xbf16, #tpu.memory_space<vmem>>, vector<64x512xbf16>
    %cst_55 = arith.constant dense<0.000000e+00> : vector<8x512xf32>
    %105 = tpu.matmul %103, %104, %cst_55 {dimension_numbers = #tpu.dot_dimension_numbers<[1], [0], [0], [1], [0, 0, 1, 1], [], []>} : vector<8x64xbf16>, vector<64x512xbf16>, vector<8x512xf32> -> vector<8x512xf32>
    %106 = arith.addf %79, %105 : vector<8x512xf32>
    %c0_56 = arith.constant 0 : index
    %c0_57 = arith.constant 0 : index
    %107 = vector.load %arg7[%c0_56, %c0_57] : memref<1x512xf32, #tpu.memory_space<vmem>>, vector<1x512xf32>
    %108 = vector.broadcast %107 : vector<1x512xf32> to vector<8x512xf32>
    %109 = arith.addf %106, %108 : vector<8x512xf32>
    %cst_58 = arith.constant 0.000000e+00 : f32
    %110 = vector.broadcast %cst_58 : f32 to vector<8x512xf32>
    %111 = arith.maximumf %109, %110 : vector<8x512xf32>
    %112 = arith.truncf %111 : vector<8x512xf32> to vector<8x512xbf16>
    %c0_59 = arith.constant 0 : index
    %c0_60 = arith.constant 0 : index
    %113 = vector.load %arg8[%c0_59, %c0_60] : memref<512x128xbf16, #tpu.memory_space<vmem>>, vector<512x128xbf16>
    %cst_61 = arith.constant dense<0.000000e+00> : vector<8x128xf32>
    %114 = tpu.matmul %112, %113, %cst_61 {dimension_numbers = #tpu.dot_dimension_numbers<[1], [0], [0], [1], [0, 0, 1, 1], [], []>} : vector<8x512xbf16>, vector<512x128xbf16>, vector<8x128xf32> -> vector<8x128xf32>
    %c0_62 = arith.constant 0 : index
    %c0_63 = arith.constant 0 : index
    %115 = vector.load %arg9[%c0_62, %c0_63] : memref<1x128xf32, #tpu.memory_space<vmem>>, vector<1x128xf32>
    %116 = vector.broadcast %115 : vector<1x128xf32> to vector<8x128xf32>
    %117 = arith.addf %114, %116 : vector<8x128xf32>
    %c0_64 = arith.constant 0 : index
    %c0_65 = arith.constant 0 : index
    %118 = vector.load %arg10[%c0_64, %c0_65] : memref<8x128xf32, #tpu.memory_space<vmem>>, vector<8x128xf32>
    tpu.vector_store %arg10[%c0_64, %c0_65], %117 {strides = array<i32>} : memref<8x128xf32, #tpu.memory_space<vmem>>, vector<8x128xf32>,
    return
  }
  func.func @transform_0(%arg0: i32) -> (i32, i32) {
    %c0_i32 = arith.constant 0 : i32
    %c0_i32_0 = arith.constant 0 : i32
    return %arg0, %c0_i32 : i32, i32
  }
  func.func @transform_1(%arg0: i32) -> (i32, i32) {
    %c0_i32 = arith.constant 0 : i32
    %c0_i32_0 = arith.constant 0 : i32
    %c0_i32_1 = arith.constant 0 : i32
    return %c0_i32, %c0_i32_0 : i32, i32
  }
  func.func @transform_2(%arg0: i32) -> (i32, i32) {
    %c0_i32 = arith.constant 0 : i32
    %c0_i32_0 = arith.constant 0 : i32
    %c0_i32_1 = arith.constant 0 : i32
    return %c0_i32, %c0_i32_0 : i32, i32
  }
  func.func @transform_3(%arg0: i32) -> (i32, i32) {
    %c0_i32 = arith.constant 0 : i32
    %c0_i32_0 = arith.constant 0 : i32
    %c0_i32_1 = arith.constant 0 : i32
    return %c0_i32, %c0_i32_0 : i32, i32
  }
  func.func @transform_4(%arg0: i32) -> i32 {
    %c0_i32 = arith.constant 0 : i32
    %c0_i32_0 = arith.constant 0 : i32
    return %c0_i32 : i32
  }
  func.func @transform_5(%arg0: i32) -> (i32, i32) {
    %c0_i32 = arith.constant 0 : i32
    %c0_i32_0 = arith.constant 0 : i32
    %c0_i32_1 = arith.constant 0 : i32
    return %c0_i32, %c0_i32_0 : i32, i32
  }
  func.func @transform_6(%arg0: i32) -> (i32, i32) {
    %c0_i32 = arith.constant 0 : i32
    %c0_i32_0 = arith.constant 0 : i32
    %c0_i32_1 = arith.constant 0 : i32
    return %c0_i32, %c0_i32_0 : i32, i32
  }
  func.func @transform_7(%arg0: i32) -> (i32, i32) {
    %c0_i32 = arith.constant 0 : i32
    %c0_i32_0 = arith.constant 0 : i32
    %c0_i32_1 = arith.constant 0 : i32
    return %c0_i32, %c0_i32_0 : i32, i32
  }
  func.func @transform_8(%arg0: i32) -> (i32, i32) {
    %c0_i32 = arith.constant 0 : i32
    %c0_i32_0 = arith.constant 0 : i32
    %c0_i32_1 = arith.constant 0 : i32
    return %c0_i32, %c0_i32_0 : i32, i32
  }
  func.func @transform_9(%arg0: i32) -> (i32, i32) {
    %c0_i32 = arith.constant 0 : i32
    %c0_i32_0 = arith.constant 0 : i32
    return %arg0, %c0_i32 : i32, i32
  }
}

</mosaic_0001>

<bundles_post_ra>
// kernel: dqn_forward_pallas.3
= control target key start
LH: loop header
LB: loop body
LE: loop exit
PB: predicated region body
PF: predicated region fallthrough
CT: control target
= control target key end

     0   :  { %s775_s12 = smov 0   ;;  %s923_s0 = inlined_call_operand.vmem [shape: bf16[208,256], index: 0, kind: input, shape index: {}]   ;;  %s924_s1 = inlined_call_operand.vmem [shape: bf16[256,32], index: 1, kind: input, shape index: {}]   ;;  %s925_s2 = inlined_call_operand.vmem [shape: f32[1,32], index: 2, kind: input, shape index: {}]   ;;  %s926_s3 = inlined_call_operand.vmem [shape: bf16[208,32], index: 3, kind: output, shape index: {}]  }
   0x1 LB: > { %s571_s13 = sadd.s32 4294967295, %s753_s12   ;;  %p575_p0 = scmp.ge.s32.totalorder %s753_s12, 1  ;;  %s753_s12 = sphi %s775_s12, %s13_s12  }
   0x2   : > { %p139_p1 = scmp.lt.s32.totalorder %s753_s12, 3 }
   0x4   : > { %p140_p2 = pnand %p575_p0, %p139_p1 }
   0x5   : > { %s164_s26 = smul.u32 (!%p140_p2), 13, %s571_s13 }
   0x6   : > { %143 = sbr.rel (%p140_p2) target bundleno = 233 (0xe9), region = 32 }
   0x7   : > { %p165_p3 = scmp.lt.s32.totalorder (!%p140_p2), %s164_s26, 25 }
   0xb   : > { %v713_v0 = vld [vmem:[%s924_s1 + $0x38] sm:$0xff]  ;;  %v712_v2 = vld [vmem:[%s924_s1 + $0x30] sm:$0xff]  ;;  %v711_v4 = vld [vmem:[%s924_s1 + $0x28] sm:$0xff]  ;;  %s928_s26 = smov (!%p165_p3, %s164_s26), 25  ;;  %vm501_vm0 = vcmask 257024  }
   0xc   : > { %v721_v1 = vld [vmem:[%s924_s1 + $0x78] sm:$0xff]  ;;  %389 = vmatpush.bf16.msra.mxu0 %v713_v0  ;;  %722 = vmatpush.bf16.msra.mxu2 %v713_v0  ;;  %v720_v3 = vld [vmem:[%s924_s1 + $0x70] sm:$0xff]  ;;  %v719_v5 = vld [vmem:[%s924_s1 + $0x68] sm:$0xff]  ;;  %s693_s13 = sshll.u32 %s928_s26, 3  ;;  %s578_s28 = sshll.u32 %s928_s26, 2 }
   0xd   : > { %432 = vmatpush.bf16.msra.mxu1 %v721_v1  ;;  %730 = vmatpush.bf16.msra.mxu3 %v721_v1  ;;  %v710_v6 = vld [vmem:[%s924_s1 + $0x20] sm:$0xff]  ;;  %v709_v8 = vld [vmem:[%s924_s1 + $0x18] sm:$0xff]  ;;  %v708_v10 = vld [vmem:[%s924_s1 + $0x10] sm:$0xff]  ;;  %s828_s18 = scalar_lea.vmem %s923_s0, %s693_s13  ;;  %s874_s4 = scalar_lea.vmem %s926_s3, %s578_s28 }
   0xe   : > { %v718_v7 = vld [vmem:[%s924_s1 + $0x60] sm:$0xff]  ;;  %v717_v9 = vld [vmem:[%s924_s1 + $0x58] sm:$0xff]  ;;  %v716_v11 = vld [vmem:[%s924_s1 + $0x50] sm:$0xff] }
   0xf   : > { %v707_v12 = vld [vmem:[%s924_s1 + $0x8] sm:$0xff]  ;;  %v706_v14 = vld [vmem:[%s924_s1] sm:$0xff]  ;;  %v605_v18 = vld [vmem:[%s828_s18 + $0x30] sm:$0xf] }
  0x10   : > { %390 = vmatpush.bf16.msra.mxu0 %v712_v2  ;;  %723 = vmatpush.bf16.msra.mxu2 %v712_v2  ;;  %v715_v13 = vld [vmem:[%s924_s1 + $0x48] sm:$0xff]  ;;  %v714_v15 = vld [vmem:[%s924_s1 + $0x40] sm:$0xff]  ;;  %v701_v19 = vld [vmem:[%s828_s18 + $0x34] sm:$0xf0] }
  0x11   : > { %433 = vmatpush.bf16.msra.mxu1 %v720_v3  ;;  %731 = vmatpush.bf16.msra.mxu3 %v720_v3  ;;  %v581_v16 = vld [vmem:[%s828_s18] sm:$0xf]  ;;  %v695_v17 = vld [vmem:[%s828_s18 + $0x4] sm:$0xf0]  ;;  %v694_v20 = vld [vmem:[%s828_s18 + $0x4] sm:$0xf]  ;;  %v606_v25 = vor.u32 %v701_v19, %v605_v18 }
  0x12   : > { %v583_v21 = vld [vmem:[%s828_s18 + $0x8] sm:$0xf0]  ;;  %v702_v22 = vld [vmem:[%s828_s18 + $0x44] sm:$0xf]  ;;  %v582_v24 = vor.u32 %v695_v17, %v581_v16  ;;  %v589_v28 = vld [vmem:[%s828_s18 + $0x10] sm:$0xf] }
  0x13   : > { %v615_v23 = vld [vmem:[%s828_s18 + $0x48] sm:$0xf0]  ;;  %v586_v26 = vor.u32 %v694_v20, %v583_v21  ;;  %v697_v29 = vld [vmem:[%s828_s18 + $0x14] sm:$0xf0]  ;;  %v613_v30 = vld [vmem:[%s828_s18 + $0x40] sm:$0xf] }
  0x14   : > { %391 = vmatpush.bf16.msra.mxu0 %v711_v4  ;;  %724 = vmatpush.bf16.msra.mxu2 %v711_v4  ;;  %v618_v27 = vor.u32 %v702_v22, %v615_v23  ;;  %v703_v31 = vld [vmem:[%s828_s18 + $0x44] sm:$0xf0]  ;;  %v696_v32 = vld [vmem:[%s828_s18 + $0x14] sm:$0xf]  ;;  %v591_v33 = vld [vmem:[%s828_s18 + $0x18] sm:$0xf0]  ;;  %v590_v36 = vor.u32 %v697_v29, %v589_v28 }
  0x15   : > { %434 = vmatpush.bf16.msra.mxu1 %v719_v5  ;;  %732 = vmatpush.bf16.msra.mxu3 %v719_v5  ;;  %v704_v34 = vld [vmem:[%s828_s18 + $0x54] sm:$0xf]  ;;  %v623_v35 = vld [vmem:[%s828_s18 + $0x58] sm:$0xf0]  ;;  %v614_v37 = vor.u32 %v703_v31, %v613_v30  ;;  %v594_v38 = vor.u32 %v696_v32, %v591_v33  ;;  %v189_v40 = vld [vmem:[%s828_s18 + $0x60] sm:$0xff] }
  0x16   : > { %v626_v39 = vor.u32 %v704_v34, %v623_v35  ;;  %v597_v41 = vld [vmem:[%s828_s18 + $0x20] sm:$0xf]  ;;  %v699_v42 = vld [vmem:[%s828_s18 + $0x24] sm:$0xf0]  ;;  %v621_v43 = vld [vmem:[%s828_s18 + $0x50] sm:$0xf]  ;;  %v264_v45 = vunpack.c.h.b16 %v189_v40  ;;  %v263_v52 = vunpack.c.l.b16 %v189_v40 }
  0x17   : > { %v705_v44 = vld [vmem:[%s828_s18 + $0x54] sm:$0xf0]  ;;  %v698_v46 = vld [vmem:[%s828_s18 + $0x24] sm:$0xf]  ;;  %v599_v47 = vld [vmem:[%s828_s18 + $0x28] sm:$0xf0]  ;;  %v598_v48 = vor.u32 %v699_v42, %v597_v41 }
  0x18   : > { %392 = vmatpush.bf16.msra.mxu0 %v710_v6  ;;  %725 = vmatpush.bf16.msra.mxu2 %v710_v6  ;;  %v622_v49 = vor.u32 %v705_v44, %v621_v43  ;;  %v602_v50 = vor.u32 %v698_v46, %v599_v47  ;;  %v278_v51 = vpack.c.b16 %v264_v45, %v264_v45  ;;  %v700_v53 = vld [vmem:[%s828_s18 + $0x34] sm:$0xf]  ;;  %v607_v54 = vld [vmem:[%s828_s18 + $0x38] sm:$0xf0]  ;;  %v867_v57 = vld [vmem:[%s925_s2] ss:$0 sm:$0xff] }
  0x19   : > { %435 = vmatpush.bf16.msra.mxu1 %v718_v7  ;;  %733 = vmatpush.bf16.msra.mxu3 %v718_v7  ;;  %v277_v55 = vpack.c.b16 %v263_v52, %v263_v52  ;;  %v610_v56 = vor.u32 %v700_v53, %v607_v54 }
  0x1c   : > { %393 = vmatpush.bf16.msra.mxu0 %v709_v8  ;;  %726 = vmatpush.bf16.msra.mxu2 %v709_v8 }
  0x1d   : > { %436 = vmatpush.bf16.msra.mxu1 %v717_v9  ;;  %734 = vmatpush.bf16.msra.mxu3 %v717_v9 }
  0x20   : > { %394 = vmatpush.bf16.msra.mxu0 %v708_v10  ;;  %727 = vmatpush.bf16.msra.mxu2 %v708_v10 }
  0x21   : > { %437 = vmatpush.bf16.msra.mxu1 %v716_v11  ;;  %735 = vmatpush.bf16.msra.mxu3 %v716_v11 }
  0x24   : > { %395 = vmatpush.bf16.msra.mxu0 %v707_v12  ;;  %728 = vmatpush.bf16.msra.mxu2 %v707_v12 }
  0x25   : > { %438 = vmatpush.bf16.msra.mxu1 %v715_v13  ;;  %736 = vmatpush.bf16.msra.mxu3 %v715_v13 }
  0x28   : > { %396 = vmatpush.bf16.msra.mxu0 %v706_v14  ;;  %729 = vmatpush.bf16.msra.mxu2 %v706_v14 }
  0x29   : > { %439 = vmatpush.bf16.msra.mxu1 %v714_v15  ;;  %737 = vmatpush.bf16.msra.mxu3 %v714_v15 }
  0x2b   : > { %397 = vmatmul.bf16.vlgmr.msra.gmra.mxu0 %v582_v24  ;;  %412 = vmatmul.bf16.vlgmr.msra.gmra.mxu2 %v606_v25 }
  0x2c   : > { %440 = vmatmul.bf16.vlgmr.msra.gmra.mxu1 %v586_v26  ;;  %460 = vmatmul.bf16.vlgmr.msra.gmra.mxu3 %v618_v27 }
  0x3b   : > { %402 = vmatmul.bf16.gmra.mxu0 %v590_v36  ;;  %417 = vmatmul.bf16.gmra.mxu2 %v614_v37 }
  0x3c   : > { %445 = vmatmul.bf16.gmra.mxu1 %v594_v38  ;;  %465 = vmatmul.bf16.gmra.mxu3 %v626_v39 }
  0x4b   : > { %407 = vmatmul.bf16.gmra.mxu0 %v598_v48  ;;  %422 = vmatmul.bf16.gmra.mxu2 %v622_v49 }
  0x4c   : > { %450 = vmatmul.bf16.gmra.mxu1 %v602_v50  ;;  %470 = vmatmul.bf16.gmra.mxu3 %v278_v51 }
  0x5b   : > { %427 = vmatmul.bf16.gmra.mxu2 %v277_v55 }
  0x5c   : > { %455 = vmatmul.bf16.gmra.mxu1 %v610_v56 }
  0xa8   : > { %v398_v58 = vpop.f32.mrf.mxu0 }
  0xa9   : > { %v399_v59 = vadd.f32 %v867_v57, %v398_v58  ;;  %v441_v60 = vpop.f32.mrf.mxu1 }
  0xab   : > { %v442_v61 = vadd.f32 %v441_v60, %v399_v59 }
  0xad   : > { %v475_v62 = vmax.f32 %v442_v61, 0.0 }
  0xae   : > { %v876_v63 = vpop.f32.mrf.mxu2 }
  0xaf   : > { %v488_v0 = vpack.c.bf16 %v475_v62, %v475_v62  ;;  %v461_v1 = vpop.f32.mrf.mxu3  ;;  %v414_v55 = vadd.f32 %v867_v57, %v876_v63 }
  0xb0   : > { %v400_v2 = vpop.f32.mrf.mxu0 }
  0xb1   : > { %502 = vst.msk [vmem:[%s874_s4] sm:$0xf] %vm501_vm0, %v488_v0  ;;  %v401_v3 = vadd.f32 %v867_v57, %v400_v2  ;;  %v443_v4 = vpop.f32.mrf.mxu1 }
  0xb3   : > { %v444_v5 = vadd.f32 %v443_v4, %v401_v3 }
  0xb5   : > { %v476_v6 = vmax.f32 %v444_v5, 0.0 }
  0xb6   : > { %v881_v7 = vpop.f32.mrf.mxu2 }
  0xb7   : > { %v489_v8 = vpack.c.bf16 %v476_v6, %v476_v6  ;;  %v463_v9 = vpop.f32.mrf.mxu3  ;;  %v416_v3 = vadd.f32 %v867_v57, %v881_v7 }
  0xb8   : > { %v403_v10 = vpop.f32.mrf.mxu0 }
  0xb9   : > { %503 = vst.msk [vmem:[%s874_s4 + $0x4] sm:$0xf] %vm501_vm0, %v489_v8  ;;  %v404_v11 = vadd.f32 %v867_v57, %v403_v10  ;;  %v446_v12 = vpop.f32.mrf.mxu1 }
  0xbb   : > { %v447_v13 = vadd.f32 %v446_v12, %v404_v11 }
  0xbd   : > { %v477_v14 = vmax.f32 %v447_v13, 0.0 }
  0xbe   : > { %v418_v15 = vpop.f32.mrf.mxu2 }
  0xbf   : > { %v490_v16 = vpack.c.bf16 %v477_v14, %v477_v14  ;;  %v419_v17 = vadd.f32 %v867_v57, %v418_v15  ;;  %v466_v18 = vpop.f32.mrf.mxu3 }
  0xc0   : > { %v405_v19 = vpop.f32.mrf.mxu0 }
  0xc1   : > { %504 = vst.msk [vmem:[%s874_s4 + $0x8] sm:$0xf] %vm501_vm0, %v490_v16  ;;  %v462_v20 = vadd.f32 %v461_v1, %v419_v17  ;;  %v406_v21 = vadd.f32 %v867_v57, %v405_v19  ;;  %v448_v22 = vpop.f32.mrf.mxu1 }
  0xc3   : > { %v483_v23 = vmax.f32 %v462_v20, 0.0  ;;  %v449_v24 = vadd.f32 %v448_v22, %v406_v21 }
  0xc5   : > { %v496_v25 = vpack.c.bf16 %v483_v23, %v483_v23  ;;  %v478_v26 = vmax.f32 %v449_v24, 0.0 }
  0xc6   : > { %v420_v27 = vpop.f32.mrf.mxu2 }
  0xc7   : > { %510 = vst.msk [vmem:[%s874_s4 + $0x20] sm:$0xf] %vm501_vm0, %v496_v25  ;;  %v491_v28 = vpack.c.bf16 %v478_v26, %v478_v26  ;;  %v421_v29 = vadd.f32 %v867_v57, %v420_v27  ;;  %v468_v30 = vpop.f32.mrf.mxu3 }
  0xc8   : > { %v408_v31 = vpop.f32.mrf.mxu0 }
  0xc9   : > { %505 = vst.msk [vmem:[%s874_s4 + $0xc] sm:$0xf] %vm501_vm0, %v491_v28  ;;  %v464_v32 = vadd.f32 %v463_v9, %v421_v29  ;;  %v409_v33 = vadd.f32 %v867_v57, %v408_v31  ;;  %v451_v34 = vpop.f32.mrf.mxu1 }
  0xcb   : > { %v484_v35 = vmax.f32 %v464_v32, 0.0  ;;  %v452_v36 = vadd.f32 %v451_v34, %v409_v33 }
  0xcd   : > { %v497_v37 = vpack.c.bf16 %v484_v35, %v484_v35  ;;  %v479_v38 = vmax.f32 %v452_v36, 0.0 }
  0xce   : > { %v423_v39 = vpop.f32.mrf.mxu2 }
  0xcf   : > { %511 = vst.msk [vmem:[%s874_s4 + $0x24] sm:$0xf] %vm501_vm0, %v497_v37  ;;  %v492_v40 = vpack.c.bf16 %v479_v38, %v479_v38  ;;  %v424_v41 = vadd.f32 %v867_v57, %v423_v39  ;;  %v471_v42 = vpop.f32.mrf.mxu3 }
  0xd0   : > { %v410_v43 = vpop.f32.mrf.mxu0 }
  0xd1   : > { %506 = vst.msk [vmem:[%s874_s4 + $0x10] sm:$0xf] %vm501_vm0, %v492_v40  ;;  %v467_v44 = vadd.f32 %v466_v18, %v424_v41  ;;  %v411_v45 = vadd.f32 %v867_v57, %v410_v43  ;;  %v453_v46 = vpop.f32.mrf.mxu1 }
  0xd3   : > { %v485_v47 = vmax.f32 %v467_v44, 0.0  ;;  %v454_v48 = vadd.f32 %v453_v46, %v411_v45 }
  0xd5   : > { %v498_v49 = vpack.c.bf16 %v485_v47, %v485_v47  ;;  %v480_v50 = vmax.f32 %v454_v48, 0.0 }
  0xd6   : > { %v425_v51 = vpop.f32.mrf.mxu2 }
  0xd7   : > { %512 = vst.msk [vmem:[%s874_s4 + $0x28] sm:$0xf] %vm501_vm0, %v498_v49  ;;  %v493_v52 = vpack.c.bf16 %v480_v50, %v480_v50  ;;  %v426_v53 = vadd.f32 %v867_v57, %v425_v51  ;;  %v473_v54 = vpop.f32.mrf.mxu3 }
  0xd9   : > { %507 = vst.msk [vmem:[%s874_s4 + $0x14] sm:$0xf] %vm501_vm0, %v493_v52  ;;  %v469_v56 = vadd.f32 %v468_v30, %v426_v53  ;;  %v456_v58 = vpop.f32.mrf.mxu1 }
  0xda   : > { %v457_v59 = vadd.f32 %v456_v58, %v414_v55 }
  0xdb   : > { %v486_v60 = vmax.f32 %v469_v56, 0.0 }
  0xdc   : > { %v481_v61 = vmax.f32 %v457_v59, 0.0 }
  0xdd   : > { %v499_v62 = vpack.c.bf16 %v486_v60, %v486_v60 }
  0xde   : > { %v494_v0 = vpack.c.bf16 %v481_v61, %v481_v61  ;;  %v428_v1 = vpop.f32.mrf.mxu2 }
  0xdf   : > { %513 = vst.msk [vmem:[%s874_s4 + $0x2c] sm:$0xf] %vm501_vm0, %v499_v62  ;;  %v429_v2 = vadd.f32 %v867_v57, %v428_v1 }
  0xe0   : > { %508 = vst.msk [vmem:[%s874_s4 + $0x18] sm:$0xf] %vm501_vm0, %v494_v0 }
  0xe1   : > { %v472_v63 = vadd.f32 %v471_v42, %v429_v2  ;;  %v458_v4 = vpop.f32.mrf.mxu1 }
  0xe2   : > { %v459_v5 = vadd.f32 %v458_v4, %v416_v3 }
  0xe3   : > { %v487_v6 = vmax.f32 %v472_v63, 0.0 }
  0xe4   : > { %v482_v8 = vmax.f32 %v459_v5, 0.0 }
  0xe5   : > { %v500_v9 = vpack.c.bf16 %v487_v6, %v487_v6 }
  0xe6   : > { %v495_v10 = vpack.c.bf16 %v482_v8, %v482_v8  ;;  %v430_v11 = vpop.f32.mrf.mxu2 }
  0xe7   : > { %514 = vst.msk [vmem:[%s874_s4 + $0x30] sm:$0xf] %vm501_vm0, %v500_v9 }
  0xe8   : > { %509 = vst.msk [vmem:[%s874_s4 + $0x1c] sm:$0xf] %vm501_vm0, %v495_v10 }
  0xe9 PF: > { %s13_s12 = sadd.s32 1, %s753_s12  }
  0xea   : > { %p10_p4 = scmp.ge.s32.totalorder %s13_s12, 4  }
  0xec   :  { %12 = sbr.rel (!%p10_p4) target bundleno = 1 (0x1), region = 62 }

// kernel: dqn_forward_pallas.4
= control target key start
LH: loop header
LB: loop body
LE: loop exit
PB: predicated region body
PF: predicated region fallthrough
CT: control target
= control target key end

     0   :  { %s810_s12 = smov 0   ;;  %s930_s0 = inlined_call_operand.vmem [shape: bf16[32,512], index: 0, kind: input, shape index: {}]   ;;  %s931_s1 = inlined_call_operand.vmem [shape: bf16[512,64], index: 1, kind: input, shape index: {}]   ;;  %s932_s2 = inlined_call_operand.vmem [shape: f32[1,64], index: 2, kind: input, shape index: {}]   ;;  %s933_s3 = inlined_call_operand.vmem [shape: bf16[32,64], index: 3, kind: output, shape index: {}]  }
   0x1 LB: > { %s580_s13 = sadd.s32 4294967295, %s788_s12   ;;  %p584_p0 = scmp.ge.s32.totalorder %s788_s12, 1  ;;  %s788_s12 = sphi %s810_s12, %s13_s12  }
   0x2   : > { %p139_p1 = scmp.lt.s32.totalorder %s788_s12, 3 }
   0x4   : > { %p140_p2 = pnand %p584_p0, %p139_p1 }
   0x5   : > { %s585_s11 = sshll.u32 (!%p140_p2), %s580_s13, 1 }
   0x6   : > { %143 = sbr.rel (%p140_p2) target bundleno = 194 (0xc2), region = 32  ;;  %p165_p3 = scmp.lt.s32.totalorder (!%p140_p2), %s585_s11, 3 }
   0xb   : > { %v748_v0 = vld [vmem:[%s931_s1 + $0x38] sm:$0xff]  ;;  %v747_v4 = vld [vmem:[%s931_s1 + $0x30] sm:$0xff]  ;;  %v746_v8 = vld [vmem:[%s931_s1 + $0x28] sm:$0xff]  ;;  %s935_s11 = smov (!%p165_p3, %s585_s11), 3  ;;  %vm521_vm0 = vcmask 519168  }
   0xc   : > { %v756_v1 = vld [vmem:[%s931_s1 + $0x78] sm:$0xff]  ;;  %461 = vmatpush.bf16.msra.mxu0 %v748_v0  ;;  %v755_v5 = vld [vmem:[%s931_s1 + $0x70] sm:$0xff]  ;;  %v754_v9 = vld [vmem:[%s931_s1 + $0x68] sm:$0xff]  ;;  %s736_s10 = sshll.u32 %s935_s11, 4  ;;  %s589_s7 = sshll.u32 %s935_s11, 2 }
   0xd   : > { %v764_v2 = vld [vmem:[%s931_s1 + $0xb8] sm:$0xff]  ;;  %475 = vmatpush.bf16.msra.mxu1 %v756_v1  ;;  %v763_v6 = vld [vmem:[%s931_s1 + $0xb0] sm:$0xff]  ;;  %v762_v10 = vld [vmem:[%s931_s1 + $0xa8] sm:$0xff]  ;;  %s169_s20 = scalar_lea.vmem %s930_s0, %s736_s10  ;;  %s175_s10 = scalar_lea.vmem %s933_s3, %s589_s7 }
   0xe   : > { %v772_v3 = vld [vmem:[%s931_s1 + $0xf8] sm:$0xff]  ;;  %489 = vmatpush.bf16.msra.mxu2 %v764_v2  ;;  %v771_v7 = vld [vmem:[%s931_s1 + $0xf0] sm:$0xff]  ;;  %v770_v11 = vld [vmem:[%s931_s1 + $0xe8] sm:$0xff] }
   0xf   : > { %503 = vmatpush.bf16.msra.mxu3 %v772_v3  ;;  %v745_v12 = vld [vmem:[%s931_s1 + $0x20] sm:$0xff]  ;;  %v744_v16 = vld [vmem:[%s931_s1 + $0x18] sm:$0xff]  ;;  %v743_v20 = vld [vmem:[%s931_s1 + $0x10] sm:$0xff] }
  0x10   : > { %462 = vmatpush.bf16.msra.mxu0 %v747_v4  ;;  %v753_v13 = vld [vmem:[%s931_s1 + $0x60] sm:$0xff]  ;;  %v752_v17 = vld [vmem:[%s931_s1 + $0x58] sm:$0xff]  ;;  %v751_v21 = vld [vmem:[%s931_s1 + $0x50] sm:$0xff] }
  0x11   : > { %476 = vmatpush.bf16.msra.mxu1 %v755_v5  ;;  %v761_v14 = vld [vmem:[%s931_s1 + $0xa0] sm:$0xff]  ;;  %v760_v18 = vld [vmem:[%s931_s1 + $0x98] sm:$0xff]  ;;  %v759_v22 = vld [vmem:[%s931_s1 + $0x90] sm:$0xff] }
  0x12   : > { %490 = vmatpush.bf16.msra.mxu2 %v763_v6  ;;  %v769_v15 = vld [vmem:[%s931_s1 + $0xe0] sm:$0xff]  ;;  %v768_v19 = vld [vmem:[%s931_s1 + $0xd8] sm:$0xff]  ;;  %v767_v23 = vld [vmem:[%s931_s1 + $0xd0] sm:$0xff] }
  0x13   : > { %504 = vmatpush.bf16.msra.mxu3 %v771_v7  ;;  %v742_v24 = vld [vmem:[%s931_s1 + $0x8] sm:$0xff]  ;;  %v741_v28 = vld [vmem:[%s931_s1] sm:$0xff]  ;;  %v739_v33 = vld [vmem:[%s169_s20 + $0xc] sm:$0xf0] }
  0x14   : > { %463 = vmatpush.bf16.msra.mxu0 %v746_v8  ;;  %v750_v25 = vld [vmem:[%s931_s1 + $0x48] sm:$0xff]  ;;  %v749_v29 = vld [vmem:[%s931_s1 + $0x40] sm:$0xff]  ;;  %v594_v35 = vld [vmem:[%s169_s20 + $0x10] sm:$0xf0] }
  0x15   : > { %477 = vmatpush.bf16.msra.mxu1 %v754_v9  ;;  %v758_v26 = vld [vmem:[%s931_s1 + $0x88] sm:$0xff]  ;;  %v757_v30 = vld [vmem:[%s931_s1 + $0x80] sm:$0xff]  ;;  %v740_v37 = vld [vmem:[%s169_s20 + $0x14] sm:$0xf0] }
  0x16   : > { %491 = vmatpush.bf16.msra.mxu2 %v762_v10  ;;  %v766_v27 = vld [vmem:[%s931_s1 + $0xc8] sm:$0xff]  ;;  %v765_v31 = vld [vmem:[%s931_s1 + $0xc0] sm:$0xff]  ;;  %v602_v39 = vld [vmem:[%s169_s20 + $0x18] sm:$0xf0] }
  0x17   : > { %505 = vmatpush.bf16.msra.mxu3 %v770_v11  ;;  %v592_v32 = vld [vmem:[%s169_s20] sm:$0xf]  ;;  %v737_v34 = vld [vmem:[%s169_s20 + $0x4] sm:$0xf]  ;;  %v600_v36 = vld [vmem:[%s169_s20 + $0x8] sm:$0xf] }
  0x18   : > { %464 = vmatpush.bf16.msra.mxu0 %v745_v12  ;;  %v738_v38 = vld [vmem:[%s169_s20 + $0xc] sm:$0xf]  ;;  %v593_v40 = vor.u32 %v739_v33, %v592_v32  ;;  %v597_v41 = vor.u32 %v737_v34, %v594_v35  ;;  %v601_v42 = vor.u32 %v740_v37, %v600_v36  ;;  %v781_v44 = vld [vmem:[%s932_s2] ss:$0 sm:$0xff] }
  0x19   : > { %478 = vmatpush.bf16.msra.mxu1 %v753_v13  ;;  %v605_v43 = vor.u32 %v738_v38, %v602_v39 }
  0x1a   : > { %492 = vmatpush.bf16.msra.mxu2 %v761_v14 }
  0x1b   : > { %506 = vmatpush.bf16.msra.mxu3 %v769_v15 }
  0x1c   : > { %465 = vmatpush.bf16.msra.mxu0 %v744_v16 }
  0x1d   : > { %479 = vmatpush.bf16.msra.mxu1 %v752_v17 }
  0x1e   : > { %493 = vmatpush.bf16.msra.mxu2 %v760_v18 }
  0x1f   : > { %507 = vmatpush.bf16.msra.mxu3 %v768_v19 }
  0x20   : > { %466 = vmatpush.bf16.msra.mxu0 %v743_v20 }
  0x21   : > { %480 = vmatpush.bf16.msra.mxu1 %v751_v21 }
  0x22   : > { %494 = vmatpush.bf16.msra.mxu2 %v759_v22 }
  0x23   : > { %508 = vmatpush.bf16.msra.mxu3 %v767_v23 }
  0x24   : > { %467 = vmatpush.bf16.msra.mxu0 %v742_v24 }
  0x25   : > { %481 = vmatpush.bf16.msra.mxu1 %v750_v25 }
  0x26   : > { %495 = vmatpush.bf16.msra.mxu2 %v758_v26 }
  0x27   : > { %509 = vmatpush.bf16.msra.mxu3 %v766_v27 }
  0x28   : > { %468 = vmatpush.bf16.msra.mxu0 %v741_v28 }
  0x29   : > { %482 = vmatpush.bf16.msra.mxu1 %v749_v29 }
  0x2a   : > { %496 = vmatpush.bf16.msra.mxu2 %v757_v30 }
  0x2b   : > { %510 = vmatpush.bf16.msra.mxu3 %v765_v31  ;;  %469 = vmatmul.bf16.vlgmr.msra.gmra.mxu0 %v593_v40 }
  0x2c   : > { %483 = vmatmul.bf16.vlgmr.msra.gmra.mxu1 %v597_v41 }
  0x2d   : > { %497 = vmatmul.bf16.vlgmr.msra.gmra.mxu2 %v601_v42 }
  0x2e   : > { %511 = vmatmul.bf16.vlgmr.msra.gmra.mxu3 %v605_v43 }
  0xa8   : > { %v470_v45 = vpop.f32.mrf.mxu0 }
  0xa9   : > { %v471_v46 = vadd.f32 %v781_v44, %v470_v45  ;;  %v484_v47 = vpop.f32.mrf.mxu1 }
  0xab   : > { %v485_v48 = vadd.f32 %v484_v47, %v471_v46 }
  0xb0   : > { %v498_v49 = vpop.f32.mrf.mxu2  ;;  %v472_v52 = vpop.f32.mrf.mxu0 }
  0xb1   : > { %v512_v50 = vpop.f32.mrf.mxu3  ;;  %v499_v51 = vadd.f32 %v498_v49, %v485_v48  ;;  %v473_v54 = vadd.f32 %v781_v44, %v472_v52  ;;  %v486_v56 = vpop.f32.mrf.mxu1 }
  0xb3   : > { %v513_v53 = vadd.f32 %v512_v50, %v499_v51  ;;  %v487_v58 = vadd.f32 %v486_v56, %v473_v54 }
  0xb5   : > { %v517_v55 = vmax.f32 %v513_v53, 0.0 }
  0xb7   : > { %v519_v57 = vpack.c.bf16 %v517_v55, %v517_v55 }
  0xb8   : > { %v500_v59 = vpop.f32.mrf.mxu2 }
  0xb9   : > { %522 = vst.msk [vmem:[%s175_s10] sm:$0xf] %vm521_vm0, %v519_v57  ;;  %v501_v60 = vadd.f32 %v500_v59, %v487_v58  ;;  %v514_v61 = vpop.f32.mrf.mxu3 }
  0xbb   : > { %v515_v62 = vadd.f32 %v514_v61, %v501_v60 }
  0xbd   : > { %v518_v63 = vmax.f32 %v515_v62, 0.0 }
  0xbf   : > { %v520_v0 = vpack.c.bf16 %v518_v63, %v518_v63 }
  0xc1   : > { %523 = vst.msk [vmem:[%s175_s10 + $0x4] sm:$0xf] %vm521_vm0, %v520_v0 }
  0xc2 PF: > { %s13_s12 = sadd.s32 1, %s788_s12  }
  0xc3   : > { %p10_p4 = scmp.ge.s32.totalorder %s13_s12, 4  }
  0xc5   :  { %12 = sbr.rel (!%p10_p4) target bundleno = 1 (0x1), region = 62 }

// kernel: dqn_forward_pallas.5
= control target key start
LH: loop header
LB: loop body
LE: loop exit
PB: predicated region body
PF: predicated region fallthrough
CT: control target
= control target key end

     0   :  { %vm450_vm0 = vcmask 523264   ;;  %s3611_s1 = inlined_call_operand.vmem [shape: bf16[640,64], index: 1, kind: input, shape index: {}]   ;;  %s3612_s2 = inlined_call_operand.vmem [shape: f32[1,64], index: 2, kind: input, shape index: {}]   ;;  %s3613_s0 = inlined_call_operand.vmem [shape: bf16[8,2560], index: 0, kind: input, shape index: {}]   ;;  %s3614_s3 = inlined_call_operand.vmem [shape: f32[1,64], index: 3, kind: input, shape index: {}]   ;;  %s3615_s5 = inlined_call_operand.vmem [shape: bf16[256,512], index: 5, kind: input, shape index: {}]   ;;  %s3616_s4 = inlined_call_operand.<no memory space> [shape: f32[1], index: 4, kind: input, shape index: {}]   ;;  %s3617_s7 = inlined_call_operand.vmem [shape: bf16[512,128], index: 7, kind: input, shape index: {}]   ;;  %s3618_s6 = inlined_call_operand.vmem [shape: f32[1,512], index: 6, kind: input, shape index: {}]   ;;  %s3619_s8 = inlined_call_operand.vmem [shape: f32[1,128], index: 8, kind: input, shape index: {}]   ;;  %s3620_s9 = inlined_call_operand.vmem [shape: f32[8,128], index: 9, kind: output, shape index: {}]  }
   0x1   :  { %v2570_v0 = vld [vmem:[%s3611_s1 + $0x38] sm:$0xff]  ;;  %v2582_v2 = vld [vmem:[%s3611_s1 + $0x30] sm:$0xff]  ;;  %v2616_v8 = vld [vmem:[%s3611_s1 + $0x28] sm:$0xff] }
   0x2   :  { %v2575_v1 = vld [vmem:[%s3611_s1 + $0x78] sm:$0xff]  ;;  %379 = vmatpush.bf16.msra.mxu0 %v2570_v0  ;;  %v2587_v3 = vld [vmem:[%s3611_s1 + $0x70] sm:$0xff]  ;;  %v2621_v9 = vld [vmem:[%s3611_s1 + $0x68] sm:$0xff] }
   0x3   :  { %392 = vmatpush.bf16.msra.mxu1 %v2575_v1  ;;  %v2592_v4 = vld [vmem:[%s3611_s1 + $0xb8] sm:$0xff]  ;;  %v2603_v6 = vld [vmem:[%s3611_s1 + $0xb0] sm:$0xff]  ;;  %v2627_v10 = vld [vmem:[%s3611_s1 + $0xa8] sm:$0xff] }
   0x4   :  { %v2597_v5 = vld [vmem:[%s3611_s1 + $0xf8] sm:$0xff]  ;;  %405 = vmatpush.bf16.msra.mxu2 %v2592_v4  ;;  %v2609_v7 = vld [vmem:[%s3611_s1 + $0xf0] sm:$0xff]  ;;  %v2633_v11 = vld [vmem:[%s3611_s1 + $0xe8] sm:$0xff] }
   0x5   :  { %418 = vmatpush.bf16.msra.mxu3 %v2597_v5  ;;  %v2640_v12 = vld [vmem:[%s3611_s1 + $0x20] sm:$0xff]  ;;  %v2664_v16 = vld [vmem:[%s3611_s1 + $0x18] sm:$0xff]  ;;  %v2688_v20 = vld [vmem:[%s3611_s1 + $0x10] sm:$0xff] }
   0x6   :  { %380 = vmatpush.bf16.msra.mxu0 %v2582_v2  ;;  %v2645_v13 = vld [vmem:[%s3611_s1 + $0x60] sm:$0xff]  ;;  %v2669_v17 = vld [vmem:[%s3611_s1 + $0x58] sm:$0xff]  ;;  %v2693_v21 = vld [vmem:[%s3611_s1 + $0x50] sm:$0xff] }
   0x7   :  { %393 = vmatpush.bf16.msra.mxu1 %v2587_v3  ;;  %v2651_v14 = vld [vmem:[%s3611_s1 + $0xa0] sm:$0xff]  ;;  %v2675_v18 = vld [vmem:[%s3611_s1 + $0x98] sm:$0xff]  ;;  %v2699_v22 = vld [vmem:[%s3611_s1 + $0x90] sm:$0xff] }
   0x8   :  { %406 = vmatpush.bf16.msra.mxu2 %v2603_v6  ;;  %v2657_v15 = vld [vmem:[%s3611_s1 + $0xe0] sm:$0xff]  ;;  %v2681_v19 = vld [vmem:[%s3611_s1 + $0xd8] sm:$0xff]  ;;  %v2705_v23 = vld [vmem:[%s3611_s1 + $0xd0] sm:$0xff] }
   0x9   :  { %419 = vmatpush.bf16.msra.mxu3 %v2609_v7  ;;  %v2712_v24 = vld [vmem:[%s3611_s1 + $0x8] sm:$0xff]  ;;  %v34_v26 = vld [vmem:[%s3613_s0] sm:$0xff]  ;;  %v2752_v33 = vld [vmem:[%s3611_s1 + $0x138] sm:$0xff] }
   0xa   :  { %381 = vmatpush.bf16.msra.mxu0 %v2616_v8  ;;  %v2717_v25 = vld [vmem:[%s3611_s1 + $0x48] sm:$0xff]  ;;  %v2742_v30 = vld [vmem:[%s3611_s1] sm:$0xff]  ;;  %v124_v32 = vunpack.c.l.b16 %v34_v26  ;;  %v125_v35 = vunpack.c.h.b16 %v34_v26  ;;  %v2773_v40 = vld [vmem:[%s3611_s1 + $0x130] sm:$0xff] }
   0xb   :  { %394 = vmatpush.bf16.msra.mxu1 %v2621_v9  ;;  %v2726_v27 = vld [vmem:[%s3611_s1 + $0x88] sm:$0xff]  ;;  %v2747_v31 = vld [vmem:[%s3611_s1 + $0x40] sm:$0xff]  ;;  %v2802_v46 = vld [vmem:[%s3611_s1 + $0x118] sm:$0xff] }
   0xc   :  { %407 = vmatpush.bf16.msra.mxu2 %v2627_v10  ;;  %v2732_v28 = vld [vmem:[%s3611_s1 + $0xc8] sm:$0xff]  ;;  %v2758_v34 = vld [vmem:[%s3611_s1 + $0x80] sm:$0xff]  ;;  %v129_v39 = vpack.c.b16 %v124_v32, %v124_v32  ;;  %v130_v41 = vpack.c.b16 %v125_v35, %v125_v35  ;;  %v2811_v47 = vld [vmem:[%s3611_s1 + $0x110] sm:$0xff] }
   0xd   :  { %420 = vmatpush.bf16.msra.mxu3 %v2633_v11  ;;  %v35_v29 = vld [vmem:[%s3613_s0 + $0x8] sm:$0xff]  ;;  %v2764_v37 = vld [vmem:[%s3611_s1 + $0xc0] sm:$0xff]  ;;  %v36_v49 = vld [vmem:[%s3613_s0 + $0x10] sm:$0xf] }
   0xe   :  { %382 = vmatpush.bf16.msra.mxu0 %v2640_v12  ;;  %v126_v36 = vunpack.c.l.b16 %v35_v29  ;;  %v127_v38 = vunpack.c.h.b16 %v35_v29  ;;  %v2784_v44 = vld [vmem:[%s3611_s1 + $0x128] sm:$0xff]  ;;  %v2793_v45 = vld [vmem:[%s3611_s1 + $0x120] sm:$0xff]  ;;  %v494_v50 = vld [vmem:[%s3613_s0 + $0x14] sm:$0xff]  ;;  %v128_v51 = vunpack.c.l.b16 %v36_v49 }
   0xf   :  { %395 = vmatpush.bf16.msra.mxu1 %v2645_v13  ;;  %v2820_v48 = vld [vmem:[%s3611_s1 + $0x108] sm:$0xff]  ;;  %v500_v52 = vunpack.c.l.b16 %v494_v50  ;;  %v2835_v53 = vld [vmem:[%s3611_s1 + $0x100] sm:$0xff]  ;;  %v501_v55 = vunpack.c.h.b16 %v494_v50 }
  0x10   :  { %408 = vmatpush.bf16.msra.mxu2 %v2651_v14  ;;  %v131_v42 = vpack.c.b16 %v126_v36, %v126_v36  ;;  %v132_v43 = vpack.c.b16 %v127_v38, %v127_v38  ;;  %v495_v54 = vld [vmem:[%s3613_s0 + $0x1c] sm:$0xff]  ;;  %v133_v56 = vpack.c.b16 %v128_v51, %v128_v51  ;;  %v496_v61 = vld [vmem:[%s3613_s0 + $0x24] sm:$0xf] }
  0x11   :  { %421 = vmatpush.bf16.msra.mxu3 %v2657_v15  ;;  %v505_v57 = vpack.c.b16 %v500_v52, %v500_v52  ;;  %v502_v58 = vunpack.c.l.b16 %v495_v54  ;;  %v506_v59 = vpack.c.b16 %v501_v55, %v501_v55  ;;  %v503_v62 = vunpack.c.h.b16 %v495_v54 }
  0x12   :  { %383 = vmatpush.bf16.msra.mxu0 %v2664_v16  ;;  %v504_v63 = vunpack.c.l.b16 %v496_v61 }
  0x13   :  { %396 = vmatpush.bf16.msra.mxu1 %v2669_v17  ;;  %v507_v60 = vpack.c.b16 %v502_v58, %v502_v58  ;;  %v508_v26 = vpack.c.b16 %v503_v62, %v503_v62 }
  0x14   :  { %409 = vmatpush.bf16.msra.mxu2 %v2675_v18  ;;  %v509_v29 = vpack.c.b16 %v504_v63, %v504_v63 }
  0x15   :  { %422 = vmatpush.bf16.msra.mxu3 %v2681_v19 }
  0x16   :  { %384 = vmatpush.bf16.msra.mxu0 %v2688_v20 }
  0x17   :  { %397 = vmatpush.bf16.msra.mxu1 %v2693_v21 }
  0x18   :  { %410 = vmatpush.bf16.msra.mxu2 %v2699_v22 }
  0x19   :  { %423 = vmatpush.bf16.msra.mxu3 %v2705_v23 }
  0x1a   :  { %385 = vmatpush.bf16.msra.mxu0 %v2712_v24 }
  0x1b   :  { %398 = vmatpush.bf16.msra.mxu1 %v2717_v25 }
  0x1c   :  { %411 = vmatpush.bf16.msra.mxu2 %v2726_v27 }
  0x1d   :  { %424 = vmatpush.bf16.msra.mxu3 %v2732_v28 }
  0x1e   :  { %386 = vmatpush.bf16.msra.mxu0 %v2742_v30 }
  0x1f   :  { %399 = vmatpush.bf16.msra.mxu1 %v2747_v31 }
  0x20   :  { %412 = vmatpush.bf16.msra.mxu2 %v2758_v34 }
  0x21   :  { %425 = vmatpush.bf16.msra.mxu3 %v2764_v37  ;;  %387 = vmatmul.bf16.vlgmr.msra.gmra.mxu0 %v129_v39 }
  0x22   :  { %431 = vmatpush.bf16.msrb.mxu0 %v2752_v33  ;;  %400 = vmatmul.bf16.vlgmr.msra.gmra.mxu1 %v130_v41 }
  0x23   :  { %515 = vmatpush.bf16.msrb.mxu1 %v2570_v0  ;;  %413 = vmatmul.bf16.vlgmr.msra.gmra.mxu2 %v131_v42 }
  0x24   :  { %528 = vmatpush.bf16.msrb.mxu2 %v2575_v1  ;;  %426 = vmatmul.bf16.vlgmr.msra.gmra.mxu3 %v132_v43 }
  0x25   :  { %541 = vmatpush.bf16.msrb.mxu3 %v2592_v4 }
  0x26   :  { %432 = vmatpush.bf16.msrb.mxu0 %v2773_v40 }
  0x27   :  { %516 = vmatpush.bf16.msrb.mxu1 %v2582_v2 }
  0x28   :  { %529 = vmatpush.bf16.msrb.mxu2 %v2587_v3 }
  0x29   :  { %542 = vmatpush.bf16.msrb.mxu3 %v2603_v6 }
  0x2a   :  { %433 = vmatpush.bf16.msrb.mxu0 %v2784_v44 }
  0x2b   :  { %517 = vmatpush.bf16.msrb.mxu1 %v2616_v8 }
  0x2c   :  { %530 = vmatpush.bf16.msrb.mxu2 %v2621_v9 }
  0x2d   :  { %543 = vmatpush.bf16.msrb.mxu3 %v2627_v10 }
  0x2e   :  { %434 = vmatpush.bf16.msrb.mxu0 %v2793_v45 }
  0x2f   :  { %518 = vmatpush.bf16.msrb.mxu1 %v2640_v12 }
  0x30   :  { %531 = vmatpush.bf16.msrb.mxu2 %v2645_v13 }
  0x31   :  { %544 = vmatpush.bf16.msrb.mxu3 %v2651_v14 }
  0x32   :  { %435 = vmatpush.bf16.msrb.mxu0 %v2802_v46 }
  0x33   :  { %519 = vmatpush.bf16.msrb.mxu1 %v2664_v16 }
  0x34   :  { %532 = vmatpush.bf16.msrb.mxu2 %v2669_v17 }
  0x35   :  { %545 = vmatpush.bf16.msrb.mxu3 %v2675_v18 }
  0x36   :  { %436 = vmatpush.bf16.msrb.mxu0 %v2811_v47 }
  0x37   :  { %520 = vmatpush.bf16.msrb.mxu1 %v2688_v20 }
  0x38   :  { %533 = vmatpush.bf16.msrb.mxu2 %v2693_v21 }
  0x39   :  { %546 = vmatpush.bf16.msrb.mxu3 %v2699_v22 }
  0x3a   :  { %437 = vmatpush.bf16.msrb.mxu0 %v2820_v48 }
  0x3b   :  { %521 = vmatpush.bf16.msrb.mxu1 %v2712_v24 }
  0x3c   :  { %534 = vmatpush.bf16.msrb.mxu2 %v2717_v25 }
  0x3d   :  { %547 = vmatpush.bf16.msrb.mxu3 %v2726_v27 }
  0x3e   :  { %438 = vmatpush.bf16.msrb.mxu0 %v2835_v53 }
  0x3f   :  { %522 = vmatpush.bf16.msrb.mxu1 %v2742_v30 }
  0x40   :  { %535 = vmatpush.bf16.msrb.mxu2 %v2747_v31 }
  0x41   :  { %439 = vmatmul.bf16.vlgmr.msrb.gmra.mxu0 %v133_v56  ;;  %548 = vmatpush.bf16.msrb.mxu3 %v2758_v34  ;;  %v2868_v56 = vld [vmem:[%s3612_s2] ss:$0 sm:$0xff] }
  0x42   :  { %554 = vmatpush.bf16.msra.mxu0 %v2597_v5  ;;  %523 = vmatmul.bf16.vlgmr.msrb.gmra.mxu1 %v505_v57 }
  0x43   :  { %567 = vmatpush.bf16.msra.mxu1 %v2752_v33  ;;  %536 = vmatmul.bf16.vlgmr.msrb.gmra.mxu2 %v506_v59 }
  0x44   :  { %549 = vmatmul.bf16.vlgmr.msrb.gmra.mxu3 %v507_v60 }
  0x46   :  { %555 = vmatpush.bf16.msra.mxu0 %v2609_v7 }
  0x47   :  { %568 = vmatpush.bf16.msra.mxu1 %v2773_v40 }
  0x4a   :  { %556 = vmatpush.bf16.msra.mxu0 %v2633_v11 }
  0x4b   :  { %569 = vmatpush.bf16.msra.mxu1 %v2784_v44 }
  0x4e   :  { %557 = vmatpush.bf16.msra.mxu0 %v2657_v15 }
  0x4f   :  { %570 = vmatpush.bf16.msra.mxu1 %v2793_v45 }
  0x52   :  { %558 = vmatpush.bf16.msra.mxu0 %v2681_v19 }
  0x53   :  { %571 = vmatpush.bf16.msra.mxu1 %v2802_v46 }
  0x56   :  { %559 = vmatpush.bf16.msra.mxu0 %v2705_v23 }
  0x57   :  { %572 = vmatpush.bf16.msra.mxu1 %v2811_v47 }
  0x5a   :  { %560 = vmatpush.bf16.msra.mxu0 %v2732_v28 }
  0x5b   :  { %573 = vmatpush.bf16.msra.mxu1 %v2820_v48 }
  0x5e   :  { %561 = vmatpush.bf16.msra.mxu0 %v2764_v37 }
  0x5f   :  { %574 = vmatpush.bf16.msra.mxu1 %v2835_v53 }
  0x61   :  { %562 = vmatmul.bf16.vlgmr.msra.gmra.mxu0 %v508_v26 }
  0x62   :  { %575 = vmatmul.bf16.vlgmr.msra.gmra.mxu1 %v509_v29 }
  0x9e   :  { %v388_v32 = vpop.f32.mrf.mxu0 }
  0x9f   :  { %v401_v35 = vpop.f32.mrf.mxu1  ;;  %v389_v58 = vadd.f32 %v2868_v56, %v388_v32  ;;  %v2880_v32 = vld [vmem:[%s3614_s3] ss:$0 sm:$0xff] }
  0xa1   :  { %v402_v61 = vadd.f32 %v401_v35, %v389_v58  ;;  %v2386_v58 = vld [vmem:[%s3615_s5 + $0x6c] sm:$0xf0] }
  0xa6   :  { %v390_v36 = vpop.f32.mrf.mxu0  ;;  %v414_v38 = vpop.f32.mrf.mxu2 }
  0xa7   :  { %v427_v39 = vpop.f32.mrf.mxu3  ;;  %v403_v41 = vpop.f32.mrf.mxu1  ;;  %v415_v63 = vadd.f32 %v414_v38, %v402_v61  ;;  %v2402_v61 = vld [vmem:[%s3615_s5 + $0xec] sm:$0xf0] }
  0xa9   :  { %v428_v41 = vadd.f32 %v427_v39, %v415_v63 }
  0xae   :  { %v416_v42 = vpop.f32.mrf.mxu2 }
  0xaf   :  { %v429_v43 = vpop.f32.mrf.mxu3 }
  0xbe   :  { %v440_v49 = vpop.f32.mrf.mxu0 }
  0xbf   :  { %v524_v50 = vpop.f32.mrf.mxu1 }
  0xc0   :  { %v525_v60 = vadd.f32 %v2868_v56, %v524_v50 }
  0xc6   :  { %v442_v51 = vpop.f32.mrf.mxu0  ;;  %v537_v54 = vpop.f32.mrf.mxu2 }
  0xc7   :  { %v526_v52 = vpop.f32.mrf.mxu1  ;;  %v550_v55 = vpop.f32.mrf.mxu3  ;;  %v538_v62 = vadd.f32 %v537_v54, %v525_v60  ;;  %v2874_v51 = vadd.f32 %v440_v49, %v428_v41  ;;  %v1980_v60 = vld [vmem:[%s3615_s5 + $0xe0] sm:$0xf]  ;;  %v2382_v41 = vld [vmem:[%s3615_s5 + $0x4c] sm:$0xf0] }
  0xc8   :  { %v1981_v63 = vor.u32 %v2402_v61, %v1980_v60  ;;  %v1948_v60 = vld [vmem:[%s3615_s5 + $0xa0] sm:$0xf]  ;;  %v2394_v61 = vld [vmem:[%s3615_s5 + $0xac] sm:$0xf0] }
  0xc9   :  { %v551_v26 = vadd.f32 %v550_v55, %v538_v62  ;;  %v444_v39 = vmax.f32 %v2874_v51, 0.0  ;;  %v2400_v62 = vld [vmem:[%s3615_s5 + $0xe4] sm:$0xf]  ;;  %v2010_v51 = vld [vmem:[%s3615_s5 + $0x18] sm:$0xf0] }
  0xca   :  { %710 = vmatpush.bf16.msra.mxu2 %v1981_v63  ;;  %v1949_v63 = vor.u32 %v2394_v61, %v1948_v60  ;;  %v2401_v60 = vld [vmem:[%s3615_s5 + $0xec] sm:$0xf]  ;;  %v1990_v61 = vld [vmem:[%s3615_s5 + $0xf8] sm:$0xf0] }
  0xcb   :  { %v449_v49 = vmul.f32 %v2880_v32, %v444_v39 }
  0xcd   :  { %v451_v55 = vsel %vm450_vm0, %v449_v49, 0.0  ;;  %v1966_v49 = vld [vmem:[%s3615_s5 + $0xd0] sm:$0xf0] }
  0xce   :  { %v539_v57 = vpop.f32.mrf.mxu2 }
  0xcf   :  { %v552_v59 = vpop.f32.mrf.mxu3  ;;  %v2048_v57 = vld [vmem:[%s3615_s5 + $0x60] sm:$0xf] }
  0xd0   :  { %v2049_v59 = vor.u32 %v2386_v58, %v2048_v57  ;;  %v2016_v57 = vld [vmem:[%s3615_s5 + $0x20] sm:$0xf]  ;;  %v2378_v58 = vld [vmem:[%s3615_s5 + $0x2c] sm:$0xf0] }
  0xd2   :  { %845 = vmatpush.bf16.msrb.mxu0 %v2049_v59  ;;  %v2017_v59 = vor.u32 %v2378_v58, %v2016_v57  ;;  %v2403_v57 = vld [vmem:[%s3615_s5 + $0xf4] sm:$0xf0] }
  0xde   :  { %v563_v29 = vpop.f32.mrf.mxu0 }
  0xdf   :  { %v576_v36 = vpop.f32.mrf.mxu1  ;;  %v564_v42 = vadd.f32 %v563_v29, %v551_v26  ;;  %v1982_v26 = vld [vmem:[%s3615_s5 + $0xf0] sm:$0xf0] }
  0xe0   :  { %v1985_v29 = vor.u32 %v2400_v62, %v1982_v26  ;;  %v2392_v62 = vld [vmem:[%s3615_s5 + $0xa4] sm:$0xf]  ;;  %v1950_v26 = vld [vmem:[%s3615_s5 + $0xb0] sm:$0xf0] }
  0xe1   :  { %v2872_v43 = vadd.f32 %v576_v36, %v564_v42  ;;  %v2032_v36 = vld [vmem:[%s3615_s5 + $0x40] sm:$0xf] }
  0xe2   :  { %723 = vmatpush.bf16.msra.mxu3 %v1985_v29  ;;  %v2033_v42 = vor.u32 %v2382_v41, %v2032_v36  ;;  %v1953_v29 = vor.u32 %v2392_v62, %v1950_v26  ;;  %v2000_v36 = vld [vmem:[%s3615_s5] sm:$0xf]  ;;  %v2374_v41 = vld [vmem:[%s3615_s5 + $0xc] sm:$0xf0]  ;;  %v1993_v62 = vor.u32 %v2401_v60, %v1990_v61  ;;  %v2050_v26 = vld [vmem:[%s3615_s5 + $0x70] sm:$0xf0] }
  0xe3   :  { %v580_v52 = vmax.f32 %v2872_v43, 0.0  ;;  %v2042_v43 = vld [vmem:[%s3615_s5 + $0x58] sm:$0xf0] }
  0xe4   :  { %846 = vmatpush.bf16.msrb.mxu0 %v2033_v42  ;;  %v2001_v42 = vor.u32 %v2374_v41, %v2000_v36  ;;  %v1972_v36 = vld [vmem:[%s3615_s5 + $0xc8] sm:$0xf]  ;;  %v2399_v41 = vld [vmem:[%s3615_s5 + $0xd4] sm:$0xf0] }
  0xe5   :  { %v581_v35 = vmul.f32 %v2880_v32, %v580_v52 }
  0xe6   :  { %v565_v38 = vpop.f32.mrf.mxu0 }
  0xe7   :  { %v578_v50 = vpop.f32.mrf.mxu1  ;;  %v582_v54 = vsel %vm450_vm0, %v581_v35, 0.0  ;;  %v1964_v35 = vld [vmem:[%s3615_s5 + $0xc0] sm:$0xf]  ;;  %v2398_v38 = vld [vmem:[%s3615_s5 + $0xcc] sm:$0xf0] }
  0xe8   :  { %583 = vadd.xlane.f32.xlu0 %v582_v54  ;;  %v2396_v50 = vld [vmem:[%s3615_s5 + $0xc4] sm:$0xf]  ;;  %v1965_v54 = vor.u32 %v2398_v38, %v1964_v35  ;;  %847 = vmatpush.bf16.msrb.mxu0 %v2017_v59  ;;  %v1932_v35 = vld [vmem:[%s3615_s5 + $0x80] sm:$0xf]  ;;  %v2390_v38 = vld [vmem:[%s3615_s5 + $0x8c] sm:$0xf0] }
  0xea   :  { %711 = vmatpush.bf16.msra.mxu2 %v1965_v54  ;;  %v1933_v54 = vor.u32 %v2390_v38, %v1932_v35  ;;  %v1973_v35 = vor.u32 %v2399_v41, %v1972_v36  ;;  %v1974_v38 = vld [vmem:[%s3615_s5 + $0xd8] sm:$0xf0]  ;;  %v2018_v36 = vld [vmem:[%s3615_s5 + $0x30] sm:$0xf0] }
  0xec   :  { %848 = vmatpush.bf16.msrb.mxu0 %v2001_v42  ;;  %v2397_v42 = vld [vmem:[%s3615_s5 + $0xcc] sm:$0xf] }
  0xee   :  { %712 = vmatpush.bf16.msra.mxu2 %v1949_v63  ;;  %v2384_v63 = vld [vmem:[%s3615_s5 + $0x64] sm:$0xf] }
  0xf0   :  { %452 = vadd.xlane.f32.xlu0 %v451_v55  ;;  %v1969_v55 = vor.u32 %v2396_v50, %v1966_v49  ;;  %v2388_v50 = vld [vmem:[%s3615_s5 + $0x84] sm:$0xf]  ;;  %v1934_v49 = vld [vmem:[%s3615_s5 + $0x90] sm:$0xf0]  ;;  %914 = vmatpush.bf16.msra.mxu0 %v2570_v0 }
  0xf1   :  { %v1937_v58 = vor.u32 %v2388_v50, %v1934_v49  ;;  %v1977_v50 = vor.u32 %v2397_v42, %v1974_v38  ;;  %v2034_v49 = vld [vmem:[%s3615_s5 + $0x50] sm:$0xf0] }
  0xf2   :  { %724 = vmatpush.bf16.msra.mxu3 %v1969_v55  ;;  %v1988_v55 = vld [vmem:[%s3615_s5 + $0xe8] sm:$0xf]  ;;  %713 = vmatpush.bf16.msra.mxu2 %v1933_v54  ;;  %v2380_v54 = vld [vmem:[%s3615_s5 + $0x44] sm:$0xf] }
  0xf3   :  { %v1989_v59 = vor.u32 %v2403_v57, %v1988_v55  ;;  %v3004_v55 = vstv %s3616_s4  ;;  %v2037_v57 = vor.u32 %v2380_v54, %v2034_v49  ;;  %v1942_v54 = vld [vmem:[%s3615_s5 + $0x98] sm:$0xf0] }
  0xf4   :  { %915 = vmatpush.bf16.msra.mxu0 %v2582_v2  ;;  %v1956_v2 = vld [vmem:[%s3615_s5 + $0xa8] sm:$0xf] }
  0xf6   :  { %725 = vmatpush.bf16.msra.mxu3 %v1953_v29  ;;  %736 = vmatpush.bf16.msrb.mxu2 %v1989_v59  ;;  %v2053_v29 = vor.u32 %v2384_v63, %v2050_v26  ;;  %v2393_v59 = vld [vmem:[%s3615_s5 + $0xac] sm:$0xf] }
  0xf8   :  { %858 = vmatpush.bf16.msrb.mxu1 %v2053_v29  ;;  %916 = vmatpush.bf16.msra.mxu0 %v2616_v8  ;;  %v2376_v29 = vld [vmem:[%s3615_s5 + $0x24] sm:$0xf]  ;;  %v2391_v8 = vld [vmem:[%s3615_s5 + $0x94] sm:$0xf0] }
  0xf9   :  { %v2021_v41 = vor.u32 %v2376_v29, %v2018_v36 }
  0xfa   :  { %726 = vmatpush.bf16.msra.mxu3 %v1937_v58  ;;  %737 = vmatpush.bf16.msrb.mxu2 %v1973_v35  ;;  %v2395_v58 = vld [vmem:[%s3615_s5 + $0xb4] sm:$0xf0]  ;;  %v1940_v35 = vld [vmem:[%s3615_s5 + $0x88] sm:$0xf] }
  0xfb   :  { %v1957_v61 = vor.u32 %v2395_v58, %v1956_v2  ;;  %v1941_v38 = vor.u32 %v2391_v8, %v1940_v35  ;;  %v2002_v2 = vld [vmem:[%s3615_s5 + $0x10] sm:$0xf0] }
  0xfc   :  { %859 = vmatpush.bf16.msrb.mxu1 %v2037_v57  ;;  %917 = vmatpush.bf16.msra.mxu0 %v2640_v12  ;;  %v2372_v57 = vld [vmem:[%s3615_s5 + $0x4] sm:$0xf] }
  0xfd   :  { %v2005_v58 = vor.u32 %v2372_v57, %v2002_v2 }
  0xfe   :  { %749 = vmatpush.bf16.msrb.mxu3 %v1993_v62  ;;  %v1958_v62 = vld [vmem:[%s3615_s5 + $0xb8] sm:$0xf0]  ;;  %738 = vmatpush.bf16.msrb.mxu2 %v1957_v61 }
  0xff   :  { %v1961_v26 = vor.u32 %v2393_v59, %v1958_v62 }
 0x100   :  { %860 = vmatpush.bf16.msrb.mxu1 %v2021_v41  ;;  %918 = vmatpush.bf16.msra.mxu0 %v2664_v16 }
 0x102   :  { %750 = vmatpush.bf16.msrb.mxu3 %v1977_v50  ;;  %v2389_v50 = vld [vmem:[%s3615_s5 + $0x8c] sm:$0xf]  ;;  %739 = vmatpush.bf16.msrb.mxu2 %v1941_v38  ;;  %v2058_v38 = vld [vmem:[%s3615_s5 + $0x78] sm:$0xf0] }
 0x103   :  { %v1945_v49 = vor.u32 %v2389_v50, %v1942_v54 }
 0x104   :  { %861 = vmatpush.bf16.msrb.mxu1 %v2005_v58  ;;  %919 = vmatpush.bf16.msra.mxu0 %v2688_v20 }
 0x106   :  { %751 = vmatpush.bf16.msrb.mxu3 %v1961_v26 }
 0x108   :  { %927 = vmatpush.bf16.msra.mxu1 %v2575_v1  ;;  %920 = vmatpush.bf16.msra.mxu0 %v2712_v24 }
 0x10a   :  { %752 = vmatpush.bf16.msrb.mxu3 %v1945_v49 }
 0x10c   :  { %928 = vmatpush.bf16.msra.mxu1 %v2587_v3  ;;  %921 = vmatpush.bf16.msra.mxu0 %v2742_v30 }
 0x110   :  { %929 = vmatpush.bf16.msra.mxu1 %v2621_v9 }
 0x114   :  { %930 = vmatpush.bf16.msra.mxu1 %v2645_v13  ;;  %v2387_v13 = vld [vmem:[%s3615_s5 + $0x74] sm:$0xf0] }
 0x118   :  { %931 = vmatpush.bf16.msra.mxu1 %v2669_v17  ;;  %v2385_v17 = vld [vmem:[%s3615_s5 + $0x6c] sm:$0xf] }
 0x119   :  { %v2061_v58 = vor.u32 %v2385_v17, %v2058_v38  ;;  %v893_v17 = vld [vmem:[%s3613_s0 + $0x28] sm:$0xff] }
 0x11a   :  { %v899_v38 = vunpack.c.l.b16 %v893_v17 }
 0x11c   :  { %932 = vmatpush.bf16.msra.mxu1 %v2693_v21  ;;  %v2381_v21 = vld [vmem:[%s3615_s5 + $0x4c] sm:$0xf] }
 0x120   :  { %933 = vmatpush.bf16.msra.mxu1 %v2717_v25  ;;  %v2379_v25 = vld [vmem:[%s3615_s5 + $0x34] sm:$0xf0] }
 0x124   :  { %934 = vmatpush.bf16.msra.mxu1 %v2747_v31  ;;  %v2373_v31 = vld [vmem:[%s3615_s5 + $0xc] sm:$0xf] }
 0x15b   :  { %v584_v60 = vpop.xlane.xlu0 %583 }
 0x15c   :  { %v585_v63 = vadd.f32 %v584_v60, %v3004_v55 }
 0x15e   :  { %v1929_v42 = vmul.f32 -1.442695, %v585_v63 }
 0x160   :  { %2471 = vpow2.f32 %v1929_v42  ;;  %v2056_v42 = vld [vmem:[%s3615_s5 + $0x68] sm:$0xf] }
 0x161   :  { %v2057_v2 = vor.u32 %v2387_v13, %v2056_v42 }
 0x163   :  { %v453_v59 = vpop.xlane.xlu0 %452 }
 0x164   :  { %v456_v60 = vadd.f32 %v3004_v55, %v453_v59  ;;  %v2040_v59 = vld [vmem:[%s3615_s5 + $0x48] sm:$0xf] }
 0x166   :  { %v2472_v12 = vpop.eup %2471  ;;  %v1928_v61 = vmul.f32 -1.442695, %v456_v60  ;;  %v2383_v60 = vld [vmem:[%s3615_s5 + $0x54] sm:$0xf0] }
 0x167   :  { %v589_v62 = vadd.f32 1.0, %v2472_v12 }
 0x168   :  { %2473 = vpow2.f32 %v1928_v61 }
 0x169   :  { %2475 = vrcp.f32 %v589_v62  ;;  %v601_v16 = vand.u32 2147483648, %v589_v62  ;;  %v599_v20 = vand.u32 2147483647, %v589_v62  ;;  %vm595_vm2 = vweird.f32 %v589_v62 }
 0x16b   :  { %v602_v9 = vor.u32 1.1754944e-38, %v601_v16  ;;  %vm600_vm4 = vcmp.eq.f32.partialorder %v599_v20, 8.507059e+37  ;;  %v2377_v16 = vld [vmem:[%s3615_s5 + $0x2c] sm:$0xf] }
 0x16e   :  { %v2474_v63 = vpop.eup %2473 }
 0x16f   :  { %v2476_v26 = vpop.eup %2475  ;;  %v460_v29 = vadd.f32 1.0, %v2474_v63 }
 0x170   :  { %v591_v36 = vmul.f32 %v2476_v26, %v589_v62  ;;  %vm596_vm1 = vweird.f32 %v2476_v26 }
 0x171   :  { %2477 = vrcp.f32 %v460_v29  ;;  %vm597_vm3 = vmor %vm595_vm2, %vm596_vm1  ;;  %v472_v57 = vand.u32 2147483648, %v460_v29  ;;  %v470_v61 = vand.u32 2147483647, %v460_v29  ;;  %vm466_vm6 = vweird.f32 %v460_v29 }
 0x172   :  { %v592_v1 = vsub.f32 1.0, %v591_v36  ;;  %v2045_v36 = vor.u32 %v2381_v21, %v2042_v43 }
 0x173   :  { %v473_v63 = vor.u32 1.1754944e-38, %v472_v57  ;;  %vm471_vm8 = vcmp.eq.f32.partialorder %v470_v61, 8.507059e+37  ;;  %v2103_v61 = vld [vmem:[%s3615_s5 + $0x150] sm:$0xf0] }
 0x174   :  { %v593_v41 = vmul.f32 %v2476_v26, %v592_v1  ;;  %v2024_v1 = vld [vmem:[%s3615_s5 + $0x28] sm:$0xf] }
 0x176   :  { %v594_v3 = vadd.f32 %v2476_v26, %v593_v41  ;;  %v2026_v41 = vld [vmem:[%s3615_s5 + $0x38] sm:$0xf0] }
 0x177   :  { %v2478_v24 = vpop.eup %2477  ;;  %v2029_v42 = vor.u32 %v2377_v16, %v2026_v41 }
 0x178   :  { %v462_v35 = vmul.f32 %v2478_v24, %v460_v29  ;;  %v598_v8 = vsel %vm597_vm3, %v2476_v26, %v594_v3  ;;  %vm467_vm5 = vweird.f32 %v2478_v24  ;;  %v2041_v26 = vor.u32 %v2383_v60, %v2040_v59  ;;  %v2119_v59 = vld [vmem:[%s3615_s5 + $0x170] sm:$0xf0]  ;;  %v2412_v60 = vld [vmem:[%s3615_s5 + $0x144] sm:$0xf] }
 0x179   :  { %v603_v50 = vsel %vm600_vm4, %v602_v9, %v598_v8  ;;  %vm468_vm7 = vmor %vm466_vm6, %vm467_vm5  ;;  %v2025_v9 = vor.u32 %v2379_v25, %v2024_v1  ;;  %v2013_v8 = vor.u32 %v2373_v31, %v2010_v51 }
 0x17a   :  { %v463_v54 = vsub.f32 1.0, %v462_v35  ;;  %v605_v49 = vmul.f32 %v603_v50, %v580_v52  ;;  %v2375_v35 = vld [vmem:[%s3615_s5 + $0x14] sm:$0xf0]  ;;  %v900_v50 = vunpack.c.h.b16 %v893_v17 }
 0x17c   :  { %v464_v12 = vmul.f32 %v2478_v24, %v463_v54  ;;  %v606_v62 = vpack.c.bf16 %v605_v49, %v605_v49  ;;  %v905_v54 = vpack.c.b16 %v900_v50, %v900_v50  ;;  %v2071_v50 = vld [vmem:[%s3615_s5 + $0x110] sm:$0xf0] }
 0x17e   :  { %1994 = vmatmul.msk.bf16.vlgmr.msra.gmra.mxu2 %vm450_vm0, %v606_v62  ;;  %1995 = vmatmul.msk.bf16.vlgmr.msra.gmra.mxu3 %vm450_vm0, %v606_v62  ;;  %v465_v52 = vadd.f32 %v2478_v24, %v464_v12 }
 0x17f   :  { %871 = vmatpush.bf16.msra.mxu2 %v2057_v2  ;;  %884 = vmatpush.bf16.msra.mxu3 %v2061_v58  ;;  %v2416_v58 = vld [vmem:[%s3615_s5 + $0x164] sm:$0xf] }
 0x180   :  { %v469_v29 = vsel %vm468_vm7, %v2478_v24, %v465_v52  ;;  %v2008_v24 = vld [vmem:[%s3615_s5 + $0x8] sm:$0xf]  ;;  %v2122_v12 = vor.u32 %v2416_v58, %v2119_v59  ;;  %v2417_v59 = vld [vmem:[%s3615_s5 + $0x16c] sm:$0xf] }
 0x181   :  { %v474_v20 = vsel %vm471_vm8, %v473_v63, %v469_v29 }
 0x182   :  { %v476_v3 = vmul.f32 %v474_v20, %v444_v39  ;;  %v2009_v39 = vor.u32 %v2375_v35, %v2008_v24 }
 0x183   :  { %872 = vmatpush.bf16.msra.mxu2 %v2041_v26  ;;  %885 = vmatpush.bf16.msra.mxu3 %v2045_v36 }
 0x184   :  { %v477_v13 = vpack.c.bf16 %v476_v3, %v476_v3 }
 0x186   :  { %2062 = vmatmul.msk.bf16.vlgmr.msrb.gmra.mxu0 %vm450_vm0, %v477_v13  ;;  %2063 = vmatmul.msk.bf16.vlgmr.msrb.gmra.mxu1 %vm450_vm0, %v477_v13 }
 0x187   :  { %873 = vmatpush.bf16.msra.mxu2 %v2025_v9  ;;  %886 = vmatpush.bf16.msra.mxu3 %v2029_v42 }
 0x188   :  { %966 = vmatpush.bf16.msrb.mxu0 %v2752_v33  ;;  %v904_v33 = vpack.c.b16 %v899_v38, %v899_v38  ;;  %v2404_v38 = vld [vmem:[%s3615_s5 + $0x104] sm:$0xf] }
 0x18b   :  { %874 = vmatpush.bf16.msra.mxu2 %v2009_v39  ;;  %887 = vmatpush.bf16.msra.mxu3 %v2013_v8  ;;  %v2408_v39 = vld [vmem:[%s3615_s5 + $0x124] sm:$0xf]  ;;  %v2087_v8 = vld [vmem:[%s3615_s5 + $0x130] sm:$0xf0] }
 0x18c   :  { %967 = vmatpush.bf16.msrb.mxu0 %v2773_v40  ;;  %v2090_v17 = vor.u32 %v2408_v39, %v2087_v8  ;;  %v2497_v8 = vld [vmem:[%s3611_s1 + $0x58] sm:$0xff] }
 0x18e   :  { %1996 = vmatmul.msk.bf16.vlgmr.msrb.gmra.mxu2 %vm450_vm0, %v606_v62  ;;  %1997 = vmatmul.msk.bf16.vlgmr.msrb.gmra.mxu3 %vm450_vm0, %v606_v62  ;;  %v2106_v62 = vor.u32 %v2412_v60, %v2103_v61  ;;  %v2127_v60 = vld [vmem:[%s3615_s5 + $0x178] sm:$0xf0] }
 0x18f   :  { %940 = vmatpush.bf16.msrb.mxu2 %v2592_v4  ;;  %953 = vmatpush.bf16.msrb.mxu3 %v2597_v5  ;;  %v895_v5 = vld [vmem:[%s3613_s0 + $0x38] sm:$0xf] }
 0x190   :  { %968 = vmatpush.bf16.msrb.mxu0 %v2784_v44  ;;  %v2490_v61 = vld [vmem:[%s3611_s1 + $0x78] sm:$0xff] }
 0x193   :  { %941 = vmatpush.bf16.msrb.mxu2 %v2603_v6  ;;  %954 = vmatpush.bf16.msrb.mxu3 %v2609_v7  ;;  %v903_v7 = vunpack.c.l.b16 %v895_v5  ;;  %v2419_v5 = vld [vmem:[%s3615_s5 + $0x174] sm:$0xf0] }
 0x194   :  { %969 = vmatpush.bf16.msrb.mxu0 %v2793_v45 }
 0x196   :  { %922 = vmatmul.bf16.vlgmr.msra.gmra.mxu0 %v904_v33  ;;  %935 = vmatmul.bf16.vlgmr.msra.gmra.mxu1 %v905_v54  ;;  %v2074_v33 = vor.u32 %v2404_v38, %v2071_v50  ;;  %v2125_v54 = vld [vmem:[%s3615_s5 + $0x168] sm:$0xf] }
 0x197   :  { %942 = vmatpush.bf16.msrb.mxu2 %v2627_v10  ;;  %955 = vmatpush.bf16.msrb.mxu3 %v2633_v11  ;;  %v894_v11 = vld [vmem:[%s3613_s0 + $0x30] sm:$0xff] }
 0x198   :  { %970 = vmatpush.bf16.msrb.mxu0 %v2802_v46  ;;  %v901_v40 = vunpack.c.l.b16 %v894_v11  ;;  %v902_v44 = vunpack.c.h.b16 %v894_v11  ;;  %v2117_v11 = vld [vmem:[%s3615_s5 + $0x160] sm:$0xf] }
 0x19b   :  { %943 = vmatpush.bf16.msrb.mxu2 %v2651_v14  ;;  %956 = vmatpush.bf16.msrb.mxu3 %v2657_v15  ;;  %v908_v15 = vpack.c.b16 %v903_v7, %v903_v7  ;;  %v2126_v7 = vor.u32 %v2419_v5, %v2125_v54 }
 0x19c   :  { %971 = vmatpush.bf16.msrb.mxu0 %v2811_v47 }
 0x19e   :  { %2064 = vmatmul.msk.bf16.vlgmr.msra.gmra.mxu2 %vm450_vm0, %v477_v13  ;;  %2065 = vmatmul.msk.bf16.vlgmr.msra.gmra.mxu3 %vm450_vm0, %v477_v13 }
 0x19f   :  { %944 = vmatpush.bf16.msrb.mxu2 %v2675_v18  ;;  %957 = vmatpush.bf16.msrb.mxu3 %v2681_v19  ;;  %v906_v19 = vpack.c.b16 %v901_v40, %v901_v40 }
 0x1a0   :  { %972 = vmatpush.bf16.msrb.mxu0 %v2820_v48 }
 0x1a3   :  { %945 = vmatpush.bf16.msrb.mxu2 %v2699_v22  ;;  %958 = vmatpush.bf16.msrb.mxu3 %v2705_v23  ;;  %v907_v23 = vpack.c.b16 %v902_v44, %v902_v44  ;;  %v2109_v44 = vld [vmem:[%s3615_s5 + $0x148] sm:$0xf] }
 0x1a4   :  { %973 = vmatpush.bf16.msrb.mxu0 %v2835_v53 }
 0x1a7   :  { %946 = vmatpush.bf16.msrb.mxu2 %v2726_v27  ;;  %959 = vmatpush.bf16.msrb.mxu3 %v2732_v28 }
 0x1a8   :  { %1208 = vmatpush.bf16.msra.mxu0 %v2592_v4 }
 0x1a9   :  { %974 = vmatmul.bf16.vlgmr.msrb.gmra.mxu0 %v908_v15  ;;  %v2418_v15 = vld [vmem:[%s3615_s5 + $0x16c] sm:$0xf0] }
 0x1aa   :  { %v2118_v40 = vor.u32 %v2418_v15, %v2117_v11 }
 0x1ab   :  { %947 = vmatpush.bf16.msrb.mxu2 %v2758_v34  ;;  %960 = vmatpush.bf16.msrb.mxu3 %v2764_v37 }
 0x1ac   :  { %1209 = vmatpush.bf16.msra.mxu0 %v2603_v6  ;;  %1109 = vmatpush.bf16.msrb.mxu1 %v2118_v40 }
 0x1ae   :  { %948 = vmatmul.bf16.vlgmr.msrb.gmra.mxu2 %v906_v19  ;;  %961 = vmatmul.bf16.vlgmr.msrb.gmra.mxu3 %v907_v23  ;;  %v2487_v19 = vld [vmem:[%s3611_s1 + $0x30] sm:$0xff] }
 0x1af   :  { %1122 = vmatpush.bf16.msra.mxu2 %v2122_v12  ;;  %1135 = vmatpush.bf16.msra.mxu3 %v2126_v7  ;;  %v2130_v12 = vor.u32 %v2417_v59, %v2127_v60  ;;  %v2510_v59 = vld [vmem:[%s3611_s1 + $0x118] sm:$0xff]  ;;  %v2511_v60 = vld [vmem:[%s3611_s1 + $0xd0] sm:$0xff] }
 0x1b0   :  { %1210 = vmatpush.bf16.msra.mxu0 %v2627_v10 }
 0x1b3   :  { %1123 = vmatpush.bf16.msra.mxu2 %v2106_v62  ;;  %v2491_v62 = vld [vmem:[%s3611_s1 + $0x18] sm:$0xff] }
 0x1b4   :  { %1211 = vmatpush.bf16.msra.mxu0 %v2651_v14 }
 0x1b7   :  { %1124 = vmatpush.bf16.msra.mxu2 %v2090_v17  ;;  %v2498_v17 = vld [vmem:[%s3611_s1 + $0x50] sm:$0xff] }
 0x1b8   :  { %1212 = vmatpush.bf16.msra.mxu0 %v2675_v18 }
 0x1bb   :  { %1125 = vmatpush.bf16.msra.mxu2 %v2074_v33  ;;  %v2499_v33 = vld [vmem:[%s3611_s1 + $0x48] sm:$0xff] }
 0x1bc   :  { %1213 = vmatpush.bf16.msra.mxu0 %v2699_v22 }
 0x1bf   :  { %1182 = vmatpush.bf16.msrb.mxu2 %v2570_v0  ;;  %v2415_v0 = vld [vmem:[%s3615_s5 + $0x154] sm:$0xf0] }
 0x1c0   :  { %1214 = vmatpush.bf16.msra.mxu0 %v2726_v27  ;;  %v2110_v23 = vor.u32 %v2415_v0, %v2109_v44  ;;  %v1162_v44 = vld [vmem:[%s3613_s0 + $0x44] sm:$0xff] }
 0x1c1   :  { %v1169_v0 = vunpack.c.l.b16 %v1162_v44 }
 0x1c2   :  { %1136 = vmatpush.bf16.msra.mxu3 %v2110_v23 }
 0x1c3   :  { %1183 = vmatpush.bf16.msrb.mxu2 %v2487_v19 }
 0x1c4   :  { %1215 = vmatpush.bf16.msra.mxu0 %v2758_v34 }
 0x201   :  { %v715_v4 = vpop.f32.mrf.mxu2  ;;  %v728_v6 = vpop.f32.mrf.mxu3 }
 0x203   :  { %v850_v28 = vpop.f32.mrf.mxu0  ;;  %v863_v45 = vpop.f32.mrf.mxu1 }
 0x204   :  { %v3159_v46 = vadd.f32 %v850_v28, %v715_v4  ;;  %v3161_v37 = vadd.f32 %v863_v45, %v728_v6  ;;  %v2101_v4 = vld [vmem:[%s3615_s5 + $0x140] sm:$0xf]  ;;  %v2414_v6 = vld [vmem:[%s3615_s5 + $0x14c] sm:$0xf0]  ;;  %v2093_v45 = vld [vmem:[%s3615_s5 + $0x128] sm:$0xf] }
 0x205   :  { %v2102_v28 = vor.u32 %v2414_v6, %v2101_v4  ;;  %v1174_v4 = vpack.c.b16 %v1169_v0, %v1169_v0 }
 0x207   :  { %1110 = vmatpush.bf16.msrb.mxu1 %v2102_v28  ;;  %1216 = vmatmul.bf16.vlgmr.msra.gmra.mxu0 %v1174_v4  ;;  %v2434_v4 = vld [vmem:[%s3615_s5 + $0x1ec] sm:$0xf0] }
 0x209   :  { %v717_v10 = vpop.f32.mrf.mxu2  ;;  %v730_v47 = vpop.f32.mrf.mxu3 }
 0x20a   :  { %v2411_v10 = vld [vmem:[%s3615_s5 + $0x134] sm:$0xf0]  ;;  %v2488_v47 = vld [vmem:[%s3611_s1 + $0x28] sm:$0xff] }
 0x20b   :  { %v852_v48 = vpop.f32.mrf.mxu0  ;;  %v865_v14 = vpop.f32.mrf.mxu1  ;;  %1184 = vmatpush.bf16.msrb.mxu2 %v2488_v47  ;;  %v2501_v47 = vld [vmem:[%s3611_s1 + $0xf8] sm:$0xff] }
 0x20c   :  { %v2094_v48 = vor.u32 %v2411_v10, %v2093_v45  ;;  %v2085_v14 = vld [vmem:[%s3615_s5 + $0x120] sm:$0xf] }
 0x20e   :  { %1137 = vmatpush.bf16.msra.mxu3 %v2094_v48  ;;  %v2502_v48 = vld [vmem:[%s3611_s1 + $0x138] sm:$0xff] }
 0x211   :  { %v741_v53 = vpop.f32.mrf.mxu2  ;;  %v754_v18 = vpop.f32.mrf.mxu3 }
 0x213   :  { %v923_v49 = vpop.f32.mrf.mxu0  ;;  %v936_v22 = vpop.f32.mrf.mxu1 }
 0x214   :  { %v924_v25 = vadd.f32 %v2868_v56, %v923_v49  ;;  %v2077_v49 = vld [vmem:[%s3615_s5 + $0x108] sm:$0xf] }
 0x216   :  { %v937_v16 = vadd.f32 %v936_v22, %v924_v25  ;;  %v2407_v22 = vld [vmem:[%s3615_s5 + $0x114] sm:$0xf0]  ;;  %v2492_v25 = vld [vmem:[%s3611_s1 + $0x70] sm:$0xff] }
 0x219   :  { %v743_v57 = vpop.f32.mrf.mxu2  ;;  %v756_v27 = vpop.f32.mrf.mxu3 }
 0x21a   :  { %v2489_v57 = vld [vmem:[%s3611_s1 + $0x20] sm:$0xff]  ;;  %v2078_v27 = vor.u32 %v2407_v22, %v2077_v49  ;;  %v2506_v22 = vld [vmem:[%s3611_s1 + $0x128] sm:$0xff] }
 0x21b   :  { %v925_v2 = vpop.f32.mrf.mxu0  ;;  %v938_v34 = vpop.f32.mrf.mxu1  ;;  %1185 = vmatpush.bf16.msrb.mxu2 %v2489_v57 }
 0x21c   :  { %v2069_v2 = vld [vmem:[%s3615_s5 + $0x100] sm:$0xf]  ;;  %v2406_v34 = vld [vmem:[%s3615_s5 + $0x10c] sm:$0xf0]  ;;  %1138 = vmatpush.bf16.msra.mxu3 %v2078_v27 }
 0x21d   :  { %v2070_v58 = vor.u32 %v2406_v34, %v2069_v2  ;;  %v2507_v27 = vld [vmem:[%s3611_s1 + $0xe0] sm:$0xff] }
 0x21e   :  { %v2508_v34 = vld [vmem:[%s3611_s1 + $0x120] sm:$0xff] }
 0x21f   :  { %1186 = vmatpush.bf16.msrb.mxu2 %v2491_v62  ;;  %v1170_v62 = vunpack.c.h.b16 %v1162_v44 }
 0x220   :  { %1195 = vmatpush.bf16.msrb.mxu3 %v2490_v61  ;;  %v1163_v61 = vld [vmem:[%s3613_s0 + $0x4c] sm:$0xf] }
 0x221   :  { %v876_v21 = vpop.f32.mrf.mxu2  ;;  %v889_v43 = vpop.f32.mrf.mxu3 }
 0x222   :  { %v3175_v52 = vadd.f32 %v876_v21, %v741_v53  ;;  %v3177_v63 = vadd.f32 %v889_v43, %v754_v18  ;;  %v2410_v53 = vld [vmem:[%s3615_s5 + $0x12c] sm:$0xf0]  ;;  %v2413_v21 = vld [vmem:[%s3615_s5 + $0x14c] sm:$0xf]  ;;  %v2111_v43 = vld [vmem:[%s3615_s5 + $0x158] sm:$0xf0] }
 0x223   :  { %v2086_v18 = vor.u32 %v2410_v53, %v2085_v14  ;;  %v2504_v14 = vld [vmem:[%s3611_s1 + $0x130] sm:$0xff] }
 0x224   :  { %1196 = vmatpush.bf16.msrb.mxu3 %v2492_v25 }
 0x225   :  { %1111 = vmatpush.bf16.msrb.mxu1 %v2086_v18  ;;  %v2505_v18 = vld [vmem:[%s3611_s1 + $0xe8] sm:$0xff] }
 0x226   :  { %v975_v26 = vpop.f32.mrf.mxu0 }
 0x229   :  { %v878_v36 = vpop.f32.mrf.mxu2  ;;  %v891_v1 = vpop.f32.mrf.mxu3  ;;  %1112 = vmatpush.bf16.msrb.mxu1 %v2070_v58  ;;  %v2509_v58 = vld [vmem:[%s3611_s1 + $0xd8] sm:$0xff] }
 0x22a   :  { %v2409_v36 = vld [vmem:[%s3615_s5 + $0x12c] sm:$0xf]  ;;  %v2095_v1 = vld [vmem:[%s3615_s5 + $0x138] sm:$0xf0] }
 0x22d   :  { %1148 = vmatpush.bf16.msra.mxu1 %v2130_v12  ;;  %v2512_v12 = vld [vmem:[%s3611_s1 + $0x110] sm:$0xff] }
 0x22e   :  { %v977_v29 = vpop.f32.mrf.mxu0 }
 0x22f   :  { %v2493_v29 = vld [vmem:[%s3611_s1 + $0x10] sm:$0xff] }
 0x230   :  { %1187 = vmatpush.bf16.msrb.mxu2 %v2493_v29  ;;  %v2516_v29 = vld [vmem:[%s3611_s1 + $0x100] sm:$0xff] }
 0x231   :  { %v949_v41 = vpop.f32.mrf.mxu2  ;;  %v962_v20 = vpop.f32.mrf.mxu3 }
 0x232   :  { %v950_v3 = vadd.f32 %v949_v41, %v937_v16  ;;  %v2098_v16 = vor.u32 %v2409_v36, %v2095_v1  ;;  %v2494_v41 = vld [vmem:[%s3611_s1 + $0x68] sm:$0xff]  ;;  %v1175_v36 = vpack.c.b16 %v1170_v62, %v1170_v62  ;;  %v2515_v1 = vld [vmem:[%s3611_s1 + $0xc0] sm:$0xff] }
 0x233   :  { %1197 = vmatpush.bf16.msrb.mxu3 %v2494_v41 }
 0x234   :  { %v963_v9 = vadd.f32 %v962_v20, %v950_v3  ;;  %v2495_v20 = vld [vmem:[%s3611_s1 + $0x8] sm:$0xff] }
 0x235   :  { %1188 = vmatpush.bf16.msrb.mxu2 %v2495_v20 }
 0x236   :  { %v3180_v42 = vadd.f32 %v975_v26, %v963_v9  ;;  %v2114_v26 = vor.u32 %v2413_v21, %v2111_v43  ;;  %v2513_v21 = vld [vmem:[%s3611_s1 + $0xc8] sm:$0xff]  ;;  %v1171_v43 = vunpack.c.l.b16 %v1163_v61  ;;  %v2427_v61 = vld [vmem:[%s3615_s5 + $0x1b4] sm:$0xf0] }
 0x238   :  { %v979_v24 = vmax.f32 %v3180_v42, 0.0  ;;  %1149 = vmatpush.bf16.msra.mxu1 %v2114_v26  ;;  %v2503_v42 = vld [vmem:[%s3611_s1 + $0xf0] sm:$0xff]  ;;  %v2514_v26 = vld [vmem:[%s3611_s1 + $0x108] sm:$0xff]  ;;  %v1176_v25 = vpack.c.b16 %v1171_v43, %v1171_v43  ;;  %v2138_v43 = vld [vmem:[%s3615_s5 + $0x180] sm:$0xf] }
 0x239   :  { %v951_v13 = vpop.f32.mrf.mxu2  ;;  %v964_v35 = vpop.f32.mrf.mxu3  ;;  %1189 = vmatpush.bf16.msrb.mxu2 %v2742_v30  ;;  %v2500_v30 = vld [vmem:[%s3611_s1 + $0x40] sm:$0xff] }
 0x23a   :  { %v980_v31 = vmul.f32 %v2880_v32, %v979_v24  ;;  %v2405_v13 = vld [vmem:[%s3615_s5 + $0x10c] sm:$0xf]  ;;  %v2079_v35 = vld [vmem:[%s3615_s5 + $0x118] sm:$0xf0] }
 0x23c   :  { %v981_v51 = vsel %vm450_vm0, %v980_v31, 0.0  ;;  %1150 = vmatpush.bf16.msra.mxu1 %v2098_v16  ;;  %v2496_v31 = vld [vmem:[%s3611_s1 + $0x60] sm:$0xff] }
 0x23d   :  { %982 = vadd.xlane.f32.xlu1 %v981_v51  ;;  %1198 = vmatpush.bf16.msrb.mxu3 %v2496_v31  ;;  %v2082_v51 = vor.u32 %v2405_v13, %v2079_v35 }
 0x240   :  { %1151 = vmatpush.bf16.msra.mxu1 %v2082_v51 }
 0x241   :  { %1199 = vmatpush.bf16.msrb.mxu3 %v2497_v8 }
 0x245   :  { %1200 = vmatpush.bf16.msrb.mxu3 %v2498_v17 }
 0x249   :  { %1201 = vmatpush.bf16.msrb.mxu3 %v2499_v33 }
 0x24d   :  { %1202 = vmatpush.bf16.msrb.mxu3 %v2500_v30 }
 0x284   :  { %v1217_v16 = vpop.f32.mrf.mxu0 }
 0x2b0   :  { %v983_v3 = vpop.xlane.xlu1 %982 }
 0x2b1   :  { %v984_v9 = vadd.f32 %v983_v3, %v3004_v55  ;;  %v1219_v3 = vpop.f32.mrf.mxu0 }
 0x2b3   :  { %v2066_v39 = vmul.f32 -1.442695, %v984_v9 }
 0x2b5   :  { %2479 = vpow2.f32 %v2066_v39 }
 0x2bb   :  { %v2480_v38 = vpop.eup %2479 }
 0x2bc   :  { %v988_v50 = vadd.f32 1.0, %v2480_v38 }
 0x2be   :  { %2481 = vrcp.f32 %v988_v50  ;;  %v1000_v11 = vand.u32 2147483648, %v988_v50  ;;  %v998_v40 = vand.u32 2147483647, %v988_v50  ;;  %vm994_vm10 = vweird.f32 %v988_v50 }
 0x2c0   :  { %v1001_v23 = vor.u32 1.1754944e-38, %v1000_v11  ;;  %vm999_vm12 = vcmp.eq.f32.partialorder %v998_v40, 8.507059e+37 }
 0x2c4   :  { %v2482_v54 = vpop.eup %2481 }
 0x2c5   :  { %v990_v5 = vmul.f32 %v2482_v54, %v988_v50  ;;  %vm995_vm9 = vweird.f32 %v2482_v54 }
 0x2c6   :  { %vm996_vm11 = vmor %vm994_vm10, %vm995_vm9 }
 0x2c7   :  { %v991_v7 = vsub.f32 1.0, %v990_v5 }
 0x2c9   :  { %v992_v15 = vmul.f32 %v2482_v54, %v991_v7 }
 0x2cb   :  { %v993_v19 = vadd.f32 %v2482_v54, %v992_v15 }
 0x2cd   :  { %v997_v6 = vsel %vm996_vm11, %v2482_v54, %v993_v19 }
 0x2ce   :  { %v1002_v28 = vsel %vm999_vm12, %v1001_v23, %v997_v6  ;;  %v2432_v6 = vld [vmem:[%s3615_s5 + $0x1e4] sm:$0xf] }
 0x2cf   :  { %v1004_v45 = vmul.f32 %v1002_v28, %v979_v24  ;;  %v1161_v24 = vld [vmem:[%s3613_s0 + $0x3c] sm:$0xff] }
 0x2d0   :  { %v1167_v53 = vunpack.c.l.b16 %v1161_v24  ;;  %v1168_v49 = vunpack.c.h.b16 %v1161_v24  ;;  %v2430_v24 = vld [vmem:[%s3615_s5 + $0x1cc] sm:$0xf0] }
 0x2d1   :  { %v1005_v10 = vpack.c.bf16 %v1004_v45, %v1004_v45  ;;  %v2194_v45 = vld [vmem:[%s3615_s5 + $0x1e8] sm:$0xf] }
 0x2d2   :  { %v1172_v57 = vpack.c.b16 %v1167_v53, %v1167_v53  ;;  %v1173_v2 = vpack.c.b16 %v1168_v49, %v1168_v49  ;;  %v2178_v49 = vld [vmem:[%s3615_s5 + $0x1c8] sm:$0xf] }
 0x2d3   :  { %2131 = vmatmul.msk.bf16.vlgmr.msrb.gmra.mxu1 %vm450_vm0, %v1005_v10  ;;  %2132 = vmatmul.msk.bf16.vlgmr.msra.gmra.mxu2 %vm450_vm0, %v1005_v10 }
 0x2d4   :  { %2133 = vmatmul.msk.bf16.vlgmr.msra.gmra.mxu3 %vm450_vm0, %v1005_v10  ;;  %1221 = vmatpush.bf16.msrb.mxu1 %v2501_v47 }
 0x2d5   :  { %1234 = vmatpush.bf16.msra.mxu2 %v2502_v48 }
 0x2d8   :  { %1222 = vmatpush.bf16.msrb.mxu1 %v2503_v42  ;;  %v2170_v42 = vld [vmem:[%s3615_s5 + $0x1c0] sm:$0xf] }
 0x2d9   :  { %1235 = vmatpush.bf16.msra.mxu2 %v2504_v14  ;;  %v2428_v14 = vld [vmem:[%s3615_s5 + $0x1c4] sm:$0xf]  ;;  %v2171_v53 = vor.u32 %v2430_v24, %v2170_v42  ;;  %v2441_v42 = vld [vmem:[%s3617_s7 + $0x28] sm:$0xff] }
 0x2dc   :  { %1223 = vmatpush.bf16.msrb.mxu1 %v2505_v18  ;;  %v2172_v18 = vld [vmem:[%s3615_s5 + $0x1d0] sm:$0xf0] }
 0x2dd   :  { %1236 = vmatpush.bf16.msra.mxu2 %v2506_v22  ;;  %v2431_v22 = vld [vmem:[%s3615_s5 + $0x1d4] sm:$0xf0] }
 0x2e0   :  { %1224 = vmatpush.bf16.msrb.mxu1 %v2507_v27  ;;  %v2179_v27 = vor.u32 %v2431_v22, %v2178_v49  ;;  %v2456_v49 = vld [vmem:[%s3617_s7 + $0xa0] sm:$0xff] }
 0x2e1   :  { %1237 = vmatpush.bf16.msra.mxu2 %v2508_v34  ;;  %v2426_v34 = vld [vmem:[%s3615_s5 + $0x1ac] sm:$0xf0] }
 0x2e3   :  { %2134 = vmatmul.msk.bf16.vlgmr.msra.gmra.mxu1 %vm450_vm0, %v1005_v10  ;;  %1190 = vmatmul.bf16.vlgmr.msrb.gmra.mxu2 %v1172_v57  ;;  %v2435_v10 = vld [vmem:[%s3615_s5 + $0x1f4] sm:$0xf0]  ;;  %v2175_v57 = vor.u32 %v2428_v14, %v2172_v18  ;;  %v2448_v18 = vld [vmem:[%s3617_s7 + $0x60] sm:$0xff] }
 0x2e4   :  { %1225 = vmatpush.bf16.msrb.mxu1 %v2509_v58  ;;  %1203 = vmatmul.bf16.vlgmr.msrb.gmra.mxu3 %v1173_v2  ;;  %v2195_v48 = vor.u32 %v2435_v10, %v2194_v45  ;;  %v2154_v2 = vld [vmem:[%s3615_s5 + $0x1a0] sm:$0xf]  ;;  %v2424_v58 = vld [vmem:[%s3615_s5 + $0x1a4] sm:$0xf] }
 0x2e5   :  { %1238 = vmatpush.bf16.msra.mxu2 %v2510_v59  ;;  %v2155_v59 = vor.u32 %v2426_v34, %v2154_v2  ;;  %v2447_v34 = vld [vmem:[%s3617_s7 + $0x58] sm:$0xff] }
 0x2e8   :  { %1226 = vmatpush.bf16.msrb.mxu1 %v2511_v60  ;;  %v2156_v60 = vld [vmem:[%s3615_s5 + $0x1b0] sm:$0xf0] }
 0x2e9   :  { %1239 = vmatpush.bf16.msra.mxu2 %v2512_v12  ;;  %v2162_v12 = vld [vmem:[%s3615_s5 + $0x1a8] sm:$0xf]  ;;  %v2159_v62 = vor.u32 %v2424_v58, %v2156_v60  ;;  %v2455_v58 = vld [vmem:[%s3617_s7 + $0x98] sm:$0xff] }
 0x2ea   :  { %v2467_v60 = vld [vmem:[%s3617_s7 + $0xf8] sm:$0xff] }
 0x2ec   :  { %1227 = vmatpush.bf16.msrb.mxu1 %v2513_v21  ;;  %v2163_v21 = vor.u32 %v2427_v61, %v2162_v12  ;;  %v2445_v12 = vld [vmem:[%s3617_s7 + $0x48] sm:$0xff] }
 0x2ed   :  { %1240 = vmatpush.bf16.msra.mxu2 %v2514_v26  ;;  %v2422_v26 = vld [vmem:[%s3615_s5 + $0x18c] sm:$0xf0]  ;;  %v2453_v61 = vld [vmem:[%s3617_s7 + $0x88] sm:$0xff] }
 0x2f0   :  { %1228 = vmatpush.bf16.msrb.mxu1 %v2515_v1  ;;  %v2139_v1 = vor.u32 %v2422_v26, %v2138_v43  ;;  %v2444_v43 = vld [vmem:[%s3617_s7 + $0x40] sm:$0xff] }
 0x2f1   :  { %1241 = vmatpush.bf16.msra.mxu2 %v2516_v29  ;;  %v2146_v29 = vld [vmem:[%s3615_s5 + $0x188] sm:$0xf]  ;;  %v2452_v26 = vld [vmem:[%s3617_s7 + $0x80] sm:$0xff] }
 0x2f3   :  { %1229 = vmatmul.bf16.vlgmr.msrb.gmra.mxu1 %v1175_v36  ;;  %v2420_v36 = vld [vmem:[%s3615_s5 + $0x184] sm:$0xf] }
 0x2f4   :  { %1242 = vmatmul.bf16.vlgmr.msra.gmra.mxu2 %v1176_v25  ;;  %1403 = vmatpush.bf16.msra.mxu1 %v2195_v48  ;;  %v2140_v25 = vld [vmem:[%s3615_s5 + $0x190] sm:$0xf0]  ;;  %v2457_v48 = vld [vmem:[%s3617_s7 + $0xa8] sm:$0xff] }
 0x2f8   :  { %1404 = vmatpush.bf16.msra.mxu1 %v2179_v27 }
 0x2fc   :  { %1405 = vmatpush.bf16.msra.mxu1 %v2163_v21  ;;  %v2466_v21 = vld [vmem:[%s3617_s7 + $0xf0] sm:$0xff] }
 0x350   :  { %v1114_v41 = vpop.f32.mrf.mxu1 }
 0x351   :  { %v3380_v20 = vadd.f32 %v1114_v41, %v3159_v46  ;;  %v2143_v41 = vor.u32 %v2420_v36, %v2140_v25  ;;  %v2437_v36 = vld [vmem:[%s3617_s7 + $0x8] sm:$0xff]  ;;  %v2436_v25 = vld [vmem:[%s3617_s7] sm:$0xff] }
 0x356   :  { %v1127_v9 = vpop.f32.mrf.mxu2 }
 0x357   :  { %v3383_v13 = vadd.f32 %v1127_v9, %v3161_v37  ;;  %v1140_v35 = vpop.f32.mrf.mxu3 }
 0x358   :  { %v3386_v31 = vadd.f32 %v1140_v35, %v3175_v52  ;;  %v1116_v51 = vpop.f32.mrf.mxu1 }
 0x359   :  { %v2433_v51 = vld [vmem:[%s3615_s5 + $0x1ec] sm:$0xf] }
 0x35e   :  { %v1129_v39 = vpop.f32.mrf.mxu2 }
 0x35f   :  { %v1142_v8 = vpop.f32.mrf.mxu3  ;;  %v2196_v39 = vld [vmem:[%s3615_s5 + $0x1f8] sm:$0xf0] }
 0x360   :  { %v1153_v17 = vpop.f32.mrf.mxu1 }
 0x361   :  { %v3389_v38 = vadd.f32 %v1153_v17, %v3177_v63  ;;  %v2199_v17 = vor.u32 %v2433_v51, %v2196_v39 }
 0x366   :  { %v1191_v50 = vpop.f32.mrf.mxu2 }
 0x367   :  { %v1204_v33 = vpop.f32.mrf.mxu3  ;;  %v1192_v30 = vadd.f32 %v2868_v56, %v1191_v50  ;;  %v2186_v56 = vld [vmem:[%s3615_s5 + $0x1e0] sm:$0xf]  ;;  %v2429_v50 = vld [vmem:[%s3615_s5 + $0x1cc] sm:$0xf] }
 0x368   :  { %v1155_v46 = vpop.f32.mrf.mxu1  ;;  %v2187_v28 = vor.u32 %v2434_v4, %v2186_v56  ;;  %v2450_v56 = vld [vmem:[%s3617_s7 + $0x70] sm:$0xff] }
 0x369   :  { %v1205_v37 = vadd.f32 %v1204_v33, %v1192_v30  ;;  %v2425_v46 = vld [vmem:[%s3615_s5 + $0x1ac] sm:$0xf]  ;;  %v2164_v30 = vld [vmem:[%s3615_s5 + $0x1b8] sm:$0xf0]  ;;  %v2458_v4 = vld [vmem:[%s3617_s7 + $0xb0] sm:$0xff] }
 0x36a   :  { %1377 = vmatpush.bf16.msra.mxu3 %v2187_v28 }
 0x36b   :  { %v1218_v11 = vadd.f32 %v1217_v16, %v1205_v37  ;;  %v2423_v16 = vld [vmem:[%s3615_s5 + $0x194] sm:$0xf0]  ;;  %v2148_v37 = vld [vmem:[%s3615_s5 + $0x198] sm:$0xf0] }
 0x36c   :  { %v2147_v3 = vor.u32 %v2423_v16, %v2146_v29  ;;  %v2464_v29 = vld [vmem:[%s3617_s7 + $0xe0] sm:$0xff]  ;;  %v2463_v16 = vld [vmem:[%s3617_s7 + $0xd8] sm:$0xff] }
 0x36e   :  { %v1193_v54 = vpop.f32.mrf.mxu2  ;;  %1378 = vmatpush.bf16.msra.mxu3 %v2171_v53  ;;  %1406 = vmatpush.bf16.msra.mxu1 %v2147_v3  ;;  %v2461_v3 = vld [vmem:[%s3617_s7 + $0xc8] sm:$0xff] }
 0x36f   :  { %v1206_v5 = vpop.f32.mrf.mxu3  ;;  %v2167_v54 = vor.u32 %v2425_v46, %v2164_v30 }
 0x370   :  { %v1230_v7 = vpop.f32.mrf.mxu1  ;;  %v2421_v5 = vld [vmem:[%s3615_s5 + $0x18c] sm:$0xf] }
 0x371   :  { %v1231_v15 = vadd.f32 %v1230_v7, %v1218_v11 }
 0x372   :  { %1379 = vmatpush.bf16.msra.mxu3 %v2155_v59  ;;  %v2439_v59 = vld [vmem:[%s3617_s7 + $0x18] sm:$0xff] }
 0x376   :  { %1380 = vmatpush.bf16.msra.mxu3 %v2139_v1  ;;  %v2465_v1 = vld [vmem:[%s3617_s7 + $0xe8] sm:$0xff] }
 0x377   :  { %v1243_v52 = vpop.f32.mrf.mxu2 }
 0x378   :  { %v3392_v40 = vadd.f32 %v1243_v52, %v1231_v15  ;;  %v1232_v44 = vpop.f32.mrf.mxu1  ;;  %v2151_v15 = vor.u32 %v2421_v5, %v2148_v37  ;;  %v2451_v52 = vld [vmem:[%s3617_s7 + $0x78] sm:$0xff] }
 0x379   :  { %v2459_v44 = vld [vmem:[%s3617_s7 + $0xb8] sm:$0xff]  ;;  %1724 = vmatpush.bf16.msrb.mxu1 %v2451_v52 }
 0x37a   :  { %v1247_v0 = vmax.f32 %v3392_v40, 0.0  ;;  %1416 = vmatpush.bf16.msrb.mxu3 %v2199_v17  ;;  %1737 = vmatpush.bf16.msrb.mxu2 %v2459_v44  ;;  %v2446_v40 = vld [vmem:[%s3617_s7 + $0x50] sm:$0xff] }
 0x37c   :  { %v1248_v63 = vmul.f32 %v2880_v32, %v1247_v0  ;;  %v2188_v32 = vld [vmem:[%s3615_s5 + $0x1f0] sm:$0xf0] }
 0x37d   :  { %v2191_v47 = vor.u32 %v2432_v6, %v2188_v32  ;;  %v2442_v6 = vld [vmem:[%s3617_s7 + $0x30] sm:$0xff]  ;;  %1725 = vmatpush.bf16.msrb.mxu1 %v2450_v56 }
 0x37e   :  { %v1249_v19 = vsel %vm450_vm0, %v1248_v63, 0.0  ;;  %1738 = vmatpush.bf16.msrb.mxu2 %v2458_v4 }
 0x37f   :  { %v1245_v23 = vpop.f32.mrf.mxu2  ;;  %1250 = vadd.xlane.f32.xlu1 %v1249_v19  ;;  %1390 = vmatpush.bf16.msrb.mxu0 %v2191_v47  ;;  %v2443_v19 = vld [vmem:[%s3617_s7 + $0x38] sm:$0xff]  ;;  %v2449_v47 = vld [vmem:[%s3617_s7 + $0x68] sm:$0xff] }
 0x381   :  { %1726 = vmatpush.bf16.msrb.mxu1 %v2449_v47 }
 0x382   :  { %1739 = vmatpush.bf16.msrb.mxu2 %v2457_v48 }
 0x383   :  { %1391 = vmatpush.bf16.msrb.mxu0 %v2175_v57  ;;  %v2440_v57 = vld [vmem:[%s3617_s7 + $0x20] sm:$0xff] }
 0x385   :  { %1727 = vmatpush.bf16.msrb.mxu1 %v2448_v18 }
 0x386   :  { %1740 = vmatpush.bf16.msrb.mxu2 %v2456_v49 }
 0x387   :  { %1392 = vmatpush.bf16.msrb.mxu0 %v2159_v62  ;;  %v2438_v62 = vld [vmem:[%s3617_s7 + $0x10] sm:$0xff] }
 0x389   :  { %1728 = vmatpush.bf16.msrb.mxu1 %v2447_v34 }
 0x38a   :  { %1741 = vmatpush.bf16.msrb.mxu2 %v2455_v58 }
 0x38b   :  { %1393 = vmatpush.bf16.msrb.mxu0 %v2143_v41  ;;  %v2462_v41 = vld [vmem:[%s3617_s7 + $0xd0] sm:$0xff] }
 0x38d   :  { %1729 = vmatpush.bf16.msrb.mxu1 %v2446_v40 }
 0x38f   :  { %1711 = vmatpush.bf16.msra.mxu0 %v2443_v19 }
 0x391   :  { %1730 = vmatpush.bf16.msrb.mxu1 %v2445_v12 }
 0x393   :  { %1712 = vmatpush.bf16.msra.mxu0 %v2442_v6 }
 0x395   :  { %1731 = vmatpush.bf16.msrb.mxu1 %v2444_v43 }
 0x397   :  { %1713 = vmatpush.bf16.msra.mxu0 %v2441_v42 }
 0x39b   :  { %1714 = vmatpush.bf16.msra.mxu0 %v2440_v57 }
 0x39f   :  { %1715 = vmatpush.bf16.msra.mxu0 %v2439_v59 }
 0x3a3   :  { %1716 = vmatpush.bf16.msra.mxu0 %v2438_v62 }
 0x3a7   :  { %1717 = vmatpush.bf16.msra.mxu0 %v2437_v36 }
 0x3ab   :  { %1718 = vmatpush.bf16.msra.mxu0 %v2436_v25 }
 0x3f2   :  { %v1251_v9 = vpop.xlane.xlu1 %1250 }
 0x3f3   :  { %v1252_v35 = vadd.f32 %v1251_v9, %v3004_v55  ;;  %v2180_v55 = vld [vmem:[%s3615_s5 + $0x1d8] sm:$0xf0]  ;;  %v2460_v9 = vld [vmem:[%s3617_s7 + $0xc0] sm:$0xff] }
 0x3f4   :  { %v2183_v33 = vor.u32 %v2429_v50, %v2180_v55 }
 0x3f5   :  { %v2135_v8 = vmul.f32 -1.442695, %v1252_v35  ;;  %v1429_v35 = vld [vmem:[%s3618_s6] sm:$0xf] }
 0x3f6   :  { %1417 = vmatpush.bf16.msrb.mxu3 %v2183_v33  ;;  %v1432_v51 = vperm.slane %v1429_v35, 1 }
 0x3f7   :  { %2483 = vpow2.f32 %v2135_v8  ;;  %v1433_v8 = vperm.slane %v1429_v35, 2 }
 0x3fa   :  { %1418 = vmatpush.bf16.msrb.mxu3 %v2167_v54  ;;  %v1431_v54 = vperm.slane %v1429_v35, 0 }
 0x3fd   :  { %v2484_v7 = vpop.eup %2483 }
 0x3fe   :  { %v1256_v11 = vadd.f32 1.0, %v2484_v7  ;;  %1419 = vmatpush.bf16.msrb.mxu3 %v2151_v15 }
 0x400   :  { %2485 = vrcp.f32 %v1256_v11  ;;  %v1268_v32 = vand.u32 2147483648, %v1256_v11  ;;  %v1266_v10 = vand.u32 2147483647, %v1256_v11  ;;  %vm1262_vm14 = vweird.f32 %v1256_v11 }
 0x402   :  { %v1269_v14 = vor.u32 1.1754944e-38, %v1268_v32  ;;  %vm1267_vm1 = vcmp.eq.f32.partialorder %v1266_v10, 8.507059e+37 }
 0x406   :  { %v2486_v63 = vpop.eup %2485 }
 0x407   :  { %v1258_v23 = vmul.f32 %v2486_v63, %v1256_v11  ;;  %vm1263_vm13 = vweird.f32 %v2486_v63 }
 0x408   :  { %vm1264_vm15 = vmor %vm1262_vm14, %vm1263_vm13 }
 0x409   :  { %v1259_v28 = vsub.f32 1.0, %v1258_v23 }
 0x40b   :  { %v1260_v45 = vmul.f32 %v2486_v63, %v1259_v28 }
 0x40d   :  { %v1261_v24 = vadd.f32 %v2486_v63, %v1260_v45 }
 0x40f   :  { %v1265_v53 = vsel %vm1264_vm15, %v2486_v63, %v1261_v24  ;;  %v2470_v24 = vld [vmem:[%s3619_s8] ss:$0 sm:$0xff] }
 0x410   :  { %v1270_v22 = vsel %vm1267_vm1, %v1269_v14, %v1265_v53 }
 0x411   :  { %v1272_v27 = vmul.f32 %v1270_v22, %v1247_v0  ;;  %v2454_v0 = vld [vmem:[%s3617_s7 + $0x90] sm:$0xff] }
 0x412   :  { %1742 = vmatpush.bf16.msrb.mxu2 %v2454_v0 }
 0x413   :  { %v1273_v2 = vpack.c.bf16 %v1272_v27, %v1272_v27 }
 0x415   :  { %2200 = vmatmul.msk.bf16.vlgmr.msra.gmra.mxu3 %vm450_vm0, %v1273_v2  ;;  %2201 = vmatmul.msk.bf16.vlgmr.msrb.gmra.mxu0 %vm450_vm0, %v1273_v2 }
 0x416   :  { %2202 = vmatmul.msk.bf16.vlgmr.msra.gmra.mxu1 %vm450_vm0, %v1273_v2  ;;  %1750 = vmatpush.bf16.msra.mxu3 %v2467_v60 }
 0x417   :  { %1743 = vmatpush.bf16.msrb.mxu2 %v2453_v61 }
 0x41a   :  { %1751 = vmatpush.bf16.msra.mxu3 %v2466_v21 }
 0x41b   :  { %1744 = vmatpush.bf16.msrb.mxu2 %v2452_v26 }
 0x41e   :  { %1752 = vmatpush.bf16.msra.mxu3 %v2465_v1 }
 0x422   :  { %1753 = vmatpush.bf16.msra.mxu3 %v2464_v29 }
 0x425   :  { %2203 = vmatmul.msk.bf16.vlgmr.msrb.gmra.mxu3 %vm450_vm0, %v1273_v2 }
 0x426   :  { %1754 = vmatpush.bf16.msra.mxu3 %v2463_v16 }
 0x42a   :  { %1755 = vmatpush.bf16.msra.mxu3 %v2462_v41 }
 0x42e   :  { %1756 = vmatpush.bf16.msra.mxu3 %v2461_v3 }
 0x432   :  { %1757 = vmatpush.bf16.msra.mxu3 %v2460_v9 }
 0x492   :  { %v1395_v39 = vpop.f32.mrf.mxu0 }
 0x493   :  { %v1426_v17 = vadd.f32 %v1395_v39, %v3383_v13  ;;  %v1408_v50 = vpop.f32.mrf.mxu1 }
 0x494   :  { %v1427_v55 = vadd.f32 %v1408_v50, %v3386_v31  ;;  %v1434_v31 = vperm.slane %v1429_v35, 3 }
 0x495   :  { %v1440_v33 = vadd.f32 %v1432_v51, %v1426_v17 }
 0x496   :  { %v1441_v46 = vadd.f32 %v1433_v8, %v1427_v55 }
 0x497   :  { %v1444_v30 = vmax.f32 %v1440_v33, 0.0 }
 0x498   :  { %v1445_v5 = vmax.f32 %v1441_v46, 0.0  ;;  %v1382_v37 = vpop.f32.mrf.mxu3 }
 0x499   :  { %v1448_v7 = vpack.c.bf16 %v1444_v30, %v1444_v30  ;;  %v1425_v11 = vadd.f32 %v1382_v37, %v3380_v20 }
 0x49a   :  { %v1449_v15 = vpack.c.bf16 %v1445_v5, %v1445_v5  ;;  %v1397_v52 = vpop.f32.mrf.mxu0 }
 0x49b   :  { %v1439_v44 = vadd.f32 %v1431_v54, %v1425_v11  ;;  %v1410_v63 = vpop.f32.mrf.mxu1  ;;  %1732 = vmatmul.bf16.vlgmr.msrb.gmra.mxu1 %v1448_v7 }
 0x49c   :  { %1745 = vmatmul.bf16.vlgmr.msrb.gmra.mxu2 %v1449_v15 }
 0x49d   :  { %v1443_v19 = vmax.f32 %v1439_v44, 0.0 }
 0x49f   :  { %v1447_v13 = vpack.c.bf16 %v1443_v19, %v1443_v19 }
 0x4a0   :  { %v1384_v23 = vpop.f32.mrf.mxu3 }
 0x4a1   :  { %1719 = vmatmul.bf16.vlgmr.msra.gmra.mxu0 %v1447_v13 }
 0x4a8   :  { %v1421_v56 = vpop.f32.mrf.mxu3 }
 0x4a9   :  { %v1428_v4 = vadd.f32 %v1421_v56, %v3389_v38 }
 0x4ab   :  { %v1442_v6 = vadd.f32 %v1434_v31, %v1428_v4 }
 0x4ad   :  { %v1446_v28 = vmax.f32 %v1442_v6, 0.0 }
 0x4af   :  { %v1450_v32 = vpack.c.bf16 %v1446_v28, %v1446_v28 }
 0x4b0   :  { %v1423_v45 = vpop.f32.mrf.mxu3 }
 0x4b1   :  { %1758 = vmatmul.bf16.vlgmr.msra.gmra.mxu3 %v1450_v32 }
 0x518   :  { %v1733_v20 = vpop.f32.mrf.mxu1 }
 0x51e   :  { %v1720_v10 = vpop.f32.mrf.mxu0 }
 0x51f   :  { %v1746_v47 = vpop.f32.mrf.mxu2  ;;  %v1721_v53 = vadd.f32 %v2470_v24, %v1720_v10 }
 0x520   :  { %v1735_v48 = vpop.f32.mrf.mxu1 }
 0x521   :  { %v1734_v18 = vadd.f32 %v1733_v20, %v1721_v53 }
 0x523   :  { %v1747_v49 = vadd.f32 %v1746_v47, %v1734_v18 }
 0x526   :  { %v1722_v42 = vpop.f32.mrf.mxu0 }
 0x527   :  { %v1748_v14 = vpop.f32.mrf.mxu2 }
 0x534   :  { %v1759_v22 = vpop.f32.mrf.mxu3 }
 0x535   :  { %v1760_v38 = vadd.f32 %v1759_v22, %v1747_v49 }
 0x537   :  { %1763 = vst [vmem:[%s3620_s9] sm:$0xff] %v1760_v38 }
 0x53c   :  { %v1761_v57 = vpop.f32.mrf.mxu3 }

</bundles_post_ra>
